<compile_context>
chip_gen: v7x
topology: tpu7x:2x2x1
jax: 0.10.0
libtpu: 0.0.40
codegen_flags: <defaults>
</compile_context>

<pallas_src>
import numpy as np
import jax
import jax.numpy as jnp
from jax.experimental import pallas as pl
from jax.experimental.pallas import tpu as pltpu

FS = 16000
N_FFT = 512
HOP = 128
N_MELS = 80
N_FREQ = N_FFT // 2 + 1          # 257 (onesided)
N_FREQ_PAD = 384                 # pad 257 -> multiple of 128 (3 lane tiles)
N_MELS_PAD = 128                 # pad 80  -> multiple of 128
TM_MAX = 256                     # frame-rows per grid step (full MXU M-tile)


# ---------------- deterministic parameter construction (glue, numpy) --------
def _hz_to_mel(freqs):
    # slaney scale (htk=False), matches librosa.filters.mel
    freqs = np.asarray(freqs, dtype=np.float64)
    f_sp = 200.0 / 3
    mels = freqs / f_sp
    min_log_hz = 1000.0
    min_log_mel = min_log_hz / f_sp
    logstep = np.log(6.4) / 27.0
    log_t = freqs >= min_log_hz
    mels = np.where(
        log_t,
        min_log_mel + np.log(np.maximum(freqs, min_log_hz) / min_log_hz) / logstep,
        mels,
    )
    return mels


def _mel_to_hz(mels):
    mels = np.asarray(mels, dtype=np.float64)
    f_sp = 200.0 / 3
    freqs = f_sp * mels
    min_log_hz = 1000.0
    min_log_mel = min_log_hz / f_sp
    logstep = np.log(6.4) / 27.0
    log_t = mels >= min_log_mel
    freqs = np.where(log_t, min_log_hz * np.exp(logstep * (mels - min_log_mel)), freqs)
    return freqs


def mel_filterbank(fs=FS, n_fft=N_FFT, n_mels=N_MELS, fmin=0.0, fmax=None):
    if fmax is None:
        fmax = fs / 2.0
    fftfreqs = np.linspace(0.0, fs / 2.0, n_fft // 2 + 1)
    mel_f = _mel_to_hz(np.linspace(_hz_to_mel(fmin), _hz_to_mel(fmax), n_mels + 2))
    fdiff = np.diff(mel_f)
    ramps = mel_f[:, None] - fftfreqs[None, :]
    lower = -ramps[:-2] / fdiff[:-1, None]
    upper = ramps[2:] / fdiff[1:, None]
    weights = np.maximum(0.0, np.minimum(lower, upper))
    # slaney area normalization
    enorm = 2.0 / (mel_f[2 : n_mels + 2] - mel_f[:n_mels])
    weights *= enorm[:, None]
    return weights.astype(np.float32)  # (n_mels, n_freq)


def dft_matrices(n_fft=N_FFT, n_freq=N_FREQ):
    # hann window folded into the (real/imag) DFT matrices; periodic hann
    # matches torch.hann_window(n_fft). Sign of imag part is irrelevant for
    # the power spectrum.
    n = np.arange(n_fft)
    k = np.arange(n_freq)
    window = 0.5 - 0.5 * np.cos(2.0 * np.pi * n / n_fft)
    angle = 2.0 * np.pi * np.outer(n, k) / n_fft
    cos = (window[:, None] * np.cos(angle)).astype(np.float32)
    sin = (window[:, None] * (-np.sin(angle))).astype(np.float32)
    return cos, sin


_CONSTS = None


def _frontend_consts():
    # Build (and cache) the fused windowed-DFT weight [cos | sin] and the
    # transposed, padded mel filterbank exactly once per process.
    global _CONSTS
    if _CONSTS is None:
        cos_np, sin_np = dft_matrices()
        w_pad = np.zeros((N_FFT, 2 * N_FREQ_PAD), np.float32)
        w_pad[:, :N_FREQ] = cos_np                          # real part -> [0, 384)
        w_pad[:, N_FREQ_PAD : N_FREQ_PAD + N_FREQ] = sin_np  # imag part -> [384, 768)
        mel_np = mel_filterbank()                            # (n_mels, n_freq)
        mel_pad = np.zeros((N_FREQ_PAD, N_MELS_PAD), np.float32)
        mel_pad[:N_FREQ, :N_MELS] = mel_np.T
        _CONSTS = (jnp.asarray(w_pad), jnp.asarray(mel_pad))
    return _CONSTS


def frame_signal(x, n_fft=N_FFT, hop=HOP):
    # center=True STFT framing with reflect padding (torch.stft default)
    # TODO(synk): framing could be folded into the kernel (N_FFT = 4*HOP chunk
    # decomposition) to avoid the 4x-expanded HBM copy for very long inputs.
    B, T = x.shape
    pad = n_fft // 2
    xp = jnp.pad(x, ((0, 0), (pad, pad)), mode="reflect")
    n_frames = 1 + T // hop
    idx = jnp.arange(n_frames)[:, None] * hop + jnp.arange(n_fft)[None, :]
    frames = xp[:, idx]                                  # (B, n_frames, n_fft)
    return frames, n_frames


# ---------------- Pallas kernel: STFT-matmul + power + mel + log ------------
def frontend_kernel(frames_ref, w_ref, mel_ref, out_ref):
    x = frames_ref[...]                                   # (TM, N_FFT)
    # Single fused matmul for real & imag spectra: (TM,512) @ (512,768)
    # (bf16 inputs would further speed this up; kept f32 to match reference.)
    y = jnp.dot(x, w_ref[...], preferred_element_type=jnp.float32)
    re = y[:, :N_FREQ_PAD]                                # split at lane-tile boundary
    im = y[:, N_FREQ_PAD:]
    power = re * re + im * im                             # (TM, N_FREQ_PAD)
    mel = jnp.dot(power, mel_ref[...], preferred_element_type=jnp.float32)
    out_ref[...] = jnp.log(jnp.maximum(mel, 1e-10))       # LogMel clamp + log


def default_frontend(waveform, input_lengths):
    B, T = waveform.shape
    frames, n_frames = frame_signal(waveform)
    M = B * n_frames
    # Full MXU M-tile for real workloads; shrink (multiple of 8) for tiny inputs.
    tm = min(TM_MAX, -(-M // 8) * 8)
    M_pad = -(-M // tm) * tm
    frames_flat = frames.reshape(M, N_FFT)
    if M_pad != M:
        frames_flat = jnp.pad(frames_flat, ((0, M_pad - M), (0, 0)))

    w, mel_w = _frontend_consts()

    out = pl.pallas_call(
        frontend_kernel,
        out_shape=jax.ShapeDtypeStruct((M_pad, N_MELS_PAD), jnp.float32),
        grid_spec=pltpu.PrefetchScalarGridSpec(
            num_scalar_prefetch=0,
            grid=(M_pad // tm,),
            in_specs=[
                pl.BlockSpec((tm, N_FFT), lambda i: (i, 0)),
                pl.BlockSpec((N_FFT, 2 * N_FREQ_PAD), lambda i: (0, 0)),
                pl.BlockSpec((N_FREQ_PAD, N_MELS_PAD), lambda i: (0, 0)),
            ],
            out_specs=pl.BlockSpec((tm, N_MELS_PAD), lambda i: (i, 0)),
        ),
        compiler_params=pltpu.CompilerParams(dimension_semantics=("parallel",)),
    )(frames_flat, w, mel_w)

    feats = out[:M, :N_MELS].reshape(B, n_frames, N_MELS)
    # Stft output lengths with center=True: T // hop + 1
    feats_lens = input_lengths // HOP + 1
    # LogMel masks padded frames to 0.0 (make_pad_mask + masked_fill)
    frame_idx = jnp.arange(n_frames)[None, :]
    mask = frame_idx < feats_lens[:, None]
    feats = jnp.where(mask[:, :, None], feats, 0.0)
    return feats, feats_lens


if __name__ == "__main__":
    key = jax.random.PRNGKey(0)
    B, T = 2, 1024                                       # small waveform
    wav = jax.random.normal(key, (B, T), dtype=jnp.float32)
    lens = jnp.array([T, T], dtype=jnp.int32)

    feats, feats_lens = default_frontend(wav, lens)
    feats = jax.block_until_ready(feats)

    assert feats.shape == (B, T // HOP + 1, N_MELS), feats.shape
    assert feats.dtype == jnp.float32
    assert bool(jnp.all(jnp.isfinite(feats)))
    assert bool(jnp.all(feats_lens == T // HOP + 1))
    print("KERNEL_OK")
</pallas_src>

<mosaic_0001>
module attributes {stable_mosaic.version = 11 : i64} {
  func.func @frontend_kernel(%arg0: i32, %arg1: memref<24x512xf32, #tpu.memory_space<vmem>>, %arg2: memref<512x768xf32, #tpu.memory_space<vmem>>, %arg3: memref<384x128xf32, #tpu.memory_space<vmem>>, %arg4: memref<24x128xf32, #tpu.memory_space<vmem>>) attributes {dimension_semantics = [#tpu.dimension_semantics<parallel>], iteration_bounds = array<i64: 1>, scalar_prefetch = 0 : i64, scratch_operands = 0 : i64, tpu.core_type = #tpu.core_type<tc>, window_params = [{transform_indices = @transform_0, window_bounds = array<i64: 24, 512>}, {pipeline_mode = #tpu.pipeline_mode<synchronous>, transform_indices = @transform_1, window_bounds = array<i64: 512, 768>}, {pipeline_mode = #tpu.pipeline_mode<synchronous>, transform_indices = @transform_2, window_bounds = array<i64: 384, 128>}, {transform_indices = @transform_3, window_bounds = array<i64: 24, 128>}]} {
    %c0 = arith.constant 0 : index
    %c0_0 = arith.constant 0 : index
    %0 = vector.load %arg1[%c0, %c0_0] : memref<24x512xf32, #tpu.memory_space<vmem>>, vector<24x512xf32>
    %c0_1 = arith.constant 0 : index
    %c0_2 = arith.constant 0 : index
    %1 = vector.load %arg2[%c0_1, %c0_2] : memref<512x768xf32, #tpu.memory_space<vmem>>, vector<512x768xf32>
    %cst = arith.constant dense<0.000000e+00> : vector<24x768xf32>
    %2 = tpu.matmul %0, %1, %cst {dimension_numbers = #tpu.dot_dimension_numbers<[1], [0], [0], [1], [0, 0, 1, 1], [], []>} : vector<24x512xf32>, vector<512x768xf32>, vector<24x768xf32> -> vector<24x768xf32>
    %3 = vector.extract_strided_slice %2 {offsets = [0, 0], sizes = [24, 384], strides = [1, 1]} : vector<24x768xf32> to vector<24x384xf32>
    %4 = vector.extract_strided_slice %2 {offsets = [0, 384], sizes = [24, 384], strides = [1, 1]} : vector<24x768xf32> to vector<24x384xf32>
    %5 = arith.mulf %3, %3 : vector<24x384xf32>
    %6 = arith.mulf %4, %4 : vector<24x384xf32>
    %7 = arith.addf %5, %6 : vector<24x384xf32>
    %c0_3 = arith.constant 0 : index
    %c0_4 = arith.constant 0 : index
    %8 = vector.load %arg3[%c0_3, %c0_4] : memref<384x128xf32, #tpu.memory_space<vmem>>, vector<384x128xf32>
    %cst_5 = arith.constant dense<0.000000e+00> : vector<24x128xf32>
    %9 = tpu.matmul %7, %8, %cst_5 {dimension_numbers = #tpu.dot_dimension_numbers<[1], [0], [0], [1], [0, 0, 1, 1], [], []>} : vector<24x384xf32>, vector<384x128xf32>, vector<24x128xf32> -> vector<24x128xf32>
    %cst_6 = arith.constant 1.000000e-10 : f32
    %10 = vector.broadcast %cst_6 : f32 to vector<24x128xf32>
    %11 = arith.maximumf %9, %10 : vector<24x128xf32>
    %12 = math.log %11 : vector<24x128xf32>
    %c0_7 = arith.constant 0 : index
    %c0_8 = arith.constant 0 : index
    %13 = vector.load %arg4[%c0_7, %c0_8] : memref<24x128xf32, #tpu.memory_space<vmem>>, vector<24x128xf32>
    tpu.vector_store %arg4[%c0_7, %c0_8], %12 {strides = array<i32>} : memref<24x128xf32, #tpu.memory_space<vmem>>, vector<24x128xf32>,
    return
  }
  func.func @transform_0(%arg0: i32) -> (i32, i32) {
    %c0_i32 = arith.constant 0 : i32
    %c0_i32_0 = arith.constant 0 : i32
    return %arg0, %c0_i32 : i32, i32
  }
  func.func @transform_1(%arg0: i32) -> (i32, i32) {
    %c0_i32 = arith.constant 0 : i32
    %c0_i32_0 = arith.constant 0 : i32
    %c0_i32_1 = arith.constant 0 : i32
    return %c0_i32, %c0_i32_0 : i32, i32
  }
  func.func @transform_2(%arg0: i32) -> (i32, i32) {
    %c0_i32 = arith.constant 0 : i32
    %c0_i32_0 = arith.constant 0 : i32
    %c0_i32_1 = arith.constant 0 : i32
    return %c0_i32, %c0_i32_0 : i32, i32
  }
  func.func @transform_3(%arg0: i32) -> (i32, i32) {
    %c0_i32 = arith.constant 0 : i32
    %c0_i32_0 = arith.constant 0 : i32
    return %arg0, %c0_i32 : i32, i32
  }
}

</mosaic_0001>

<bundles_post_ra>
// kernel: tpu_custom_call.1
= control target key start
LH: loop header
LB: loop body
LE: loop exit
PB: predicated region body
PF: predicated region fallthrough
CT: control target
= control target key end

     0   :  { %8 = vsyncpa [#allocation3], 0  ;;  %s2045_s0 = inlined_call_operand.hbm [shape: f32[24,512], index: 0, kind: input, shape index: {}]   ;;  %s2046_s1 = inlined_call_operand.hbm [shape: f32[512,768], index: 1, kind: input, shape index: {}]   ;;  %s2047_s2 = inlined_call_operand.hbm [shape: f32[384,128], index: 2, kind: input, shape index: {}]   ;;  %s2048_s3 = inlined_call_operand.hbm [shape: f32[24,128], index: 3, kind: output, shape index: {}]  }
   0x1   :  { %9 = vsyncpa [#allocation6], 0 }
   0x2   :  { %10 = vsyncpa [#allocation4], 0  ;;  %s1887_s12 = smov [#allocation5]   ;;  %s1793_s16 = scalar_lea.hbm %s2046_s1, 49152 }
   0x3   :  { %s28_s13 = sshll.u32 %s1887_s12, 4  ;;  %p1794_p0 = scmp.ne.s32.totalorder %s2046_s1, %s1793_s16  ;;  %s29_s13 = int_to_ptr.vmem [resolvable:$true] %s28_s13 }
   0x4   :  { %p1797_p1 = scmp.lt.u32.totalorder %s1793_s16, %s2046_s1 }
   0x6   :  { %p1799_p2 = pnand %p1797_p1, %p1794_p0 }
   0x8   :  { %1802 = shalt.err (!%p1799_p2)
}
   0x9   :  { %s1803_s21 = scalar_lea.vmem %s29_s13, 49152  ;;  %p1808_p4 = scmp.lt.s32.totalorder %s29_s13, %s29_s13 }
   0xa   :  { %p1804_p3 = scmp.ne.s32.totalorder %s29_s13, %s1803_s21  ;;  %p1809_p5 = scmp.lt.s32.totalorder %s1803_s21, %s1803_s21 }
   0xc   :  { %p1810_p6 = por %p1809_p5, %p1808_p4 }
   0xe   :  { %p1811_p7 = pnand %p1810_p6, %p1804_p3 }
  0x10   :  { %1814 = shalt.err (!%p1811_p7)
}
  0x11   :  { %s1888_s22 = smov 768   ;;  %s1889_s23 = smov 48  }
  0x12   :  { %34 = dma.hbm_to_vmem [thread:$0]  %s2046_s1, 49152, %s29_s13, [#allocation6], %s1888_s22, %s1888_s22, %s1889_s23  }
  0x13   :  { %s1890_s26 = smov [#allocation2]   ;;  %s1815_s30 = scalar_lea.hbm %s2045_s0, 1536 }
  0x14   :  { %s16_s27 = sshll.u32 %s1890_s26, 4  ;;  %p1816_p8 = scmp.ne.s32.totalorder %s2045_s0, %s1815_s30  ;;  %s17_s27 = int_to_ptr.vmem [resolvable:$true] %s16_s27 }
  0x15   :  { %p1819_p9 = scmp.lt.u32.totalorder %s1815_s30, %s2045_s0 }
  0x17   :  { %p1821_p10 = pnand %p1819_p9, %p1816_p8 }
  0x19   :  { %1824 = shalt.err (!%p1821_p10)
}
  0x1a   :  { %s1825_s8 = scalar_lea.vmem %s17_s27, 1536  ;;  %p1830_p12 = scmp.lt.s32.totalorder %s17_s27, %s17_s27 }
  0x1b   :  { %p1826_p11 = scmp.ne.s32.totalorder %s17_s27, %s1825_s8  ;;  %p1831_p13 = scmp.lt.s32.totalorder %s1825_s8, %s1825_s8 }
  0x1d   :  { %p1832_p0 = por %p1831_p13, %p1830_p12 }
  0x1f   :  { %p1833_p1 = pnand %p1832_p0, %p1826_p11 }
  0x21   :  { %1836 = shalt.err (!%p1833_p1)
}
  0x22   :  { %s1891_s1 = smov 512   ;;  %s1892_s9 = smov 32  }
  0x23   :  { %22 = dma.hbm_to_vmem [thread:$0]  %s2045_s0, 1536, %s17_s27, [#allocation3], %s1891_s1, %s1891_s1, %s1892_s9  }
  0x24   :  { %s1893_s12 = smov [#allocation7]   ;;  %s1837_s16 = scalar_lea.hbm %s2047_s2, 6144 }
  0x25   :  { %s40_s13 = sshll.u32 %s1893_s12, 4  ;;  %p1838_p2 = scmp.ne.s32.totalorder %s2047_s2, %s1837_s16  ;;  %s41_s13 = int_to_ptr.vmem [resolvable:$true] %s40_s13 }
  0x26   :  { %p1841_p3 = scmp.lt.u32.totalorder %s1837_s16, %s2047_s2 }
  0x28   :  { %p1843_p4 = pnand %p1841_p3, %p1838_p2 }
  0x2a   :  { %1846 = shalt.err (!%p1843_p4)
}
  0x2b   :  { %s1847_s21 = scalar_lea.vmem %s41_s13, 6144  ;;  %p1852_p6 = scmp.lt.s32.totalorder %s41_s13, %s41_s13 }
  0x2c   :  { %p1848_p5 = scmp.ne.s32.totalorder %s41_s13, %s1847_s21  ;;  %p1853_p7 = scmp.lt.s32.totalorder %s1847_s21, %s1847_s21 }
  0x2e   :  { %p1854_p8 = por %p1853_p7, %p1852_p6 }
  0x30   :  { %p1855_p9 = pnand %p1854_p8, %p1848_p5 }
  0x32   :  { %1858 = shalt.err (!%p1855_p9)
}
  0x33   :  { %s1894_s0 = smov 128   ;;  %s1895_s22 = smov 8  }
  0x34   :  { %46 = dma.hbm_to_vmem [thread:$0]  %s2047_s2, 6144, %s41_s13, [#allocation6], %s1894_s0, %s1894_s0, %s1895_s22  }
  0x35   :  { %1881 = dma.done.wait [#allocation3], 1536  }
  0x36   :  { %1882 = vsyncadd [#allocation3], 4294965760 }
  0x37   :  { %1883 = dma.done.wait [#allocation6], 55296  }
  0x38   :  { %1884 = vsyncadd [#allocation6], 4294912000  ;;  %v69_v0 = vld [vmem:[#allocation5 + $0x8] sm:$0xff]  ;;  %v75_v1 = vld [vmem:[#allocation5 + $0x38] sm:$0xff]  ;;  %vm1897_vm0 = vmmov 0   ;;  %s1899_s2 = smov [#allocation8]  }
  0x39   :  { %v71_v2 = vld [vmem:[#allocation5 + $0x18] sm:$0xff]  ;;  %v1316_v3 = vpack.c.bf16 %v75_v1, %v69_v0  ;;  %v77_v4 = vld [vmem:[#allocation5 + $0x48] sm:$0xff]  ;;  %v68_v5 = vld [vmem:[#allocation5] sm:$0xff]  ;;  %s1202_s25 = sshll.u32 %s1899_s2, 4  ;;  %s1203_s25 = int_to_ptr.vmem [resolvable:$true] %s1202_s25 }
  0x3a   :  { %v74_v6 = vld [vmem:[#allocation5 + $0x30] sm:$0xff]  ;;  %v1444_v7 = vpack.c.bf16 %v77_v4, %v71_v2  ;;  %v76_v10 = vld [vmem:[#allocation5 + $0x40] sm:$0xff]  ;;  %v81_v11 = vld [vmem:[#allocation5 + $0x68] sm:$0xff]  ;;  %s1859_s26 = scalar_lea.vmem %s1203_s25, 384  ;;  %p1864_p11 = scmp.lt.s32.totalorder %s1203_s25, %s1203_s25 }
  0x3b   :  { %v1318_v8 = vpack.c.bf16 %v74_v6, %v68_v5  ;;  %v70_v9 = vld [vmem:[#allocation5 + $0x10] sm:$0xff]  ;;  %1317 = vmatprep.subr.bf16.mxu0 %v1316_v3  ;;  %v87_v13 = vld [vmem:[#allocation5 + $0x98] sm:$0xff]  ;;  %v89_v15 = vld [vmem:[#allocation5 + $0xa8] sm:$0xff]  ;;  %p1860_p10 = scmp.ne.s32.totalorder %s1203_s25, %s1859_s26  ;;  %p1865_p12 = scmp.lt.s32.totalorder %s1859_s26, %s1859_s26 }
  0x3c   :  { %v1446_v12 = vpack.c.bf16 %v76_v10, %v70_v9  ;;  %v83_v14 = vld [vmem:[#allocation5 + $0x78] sm:$0xff]  ;;  %1445 = vmatprep.subr.bf16.mxu1 %v1444_v7  ;;  %v1320_v16 = vpack.c.bf16 %v87_v13, %v81_v11  ;;  %v80_v18 = vld [vmem:[#allocation5 + $0x60] sm:$0xff]  ;;  %v86_v19 = vld [vmem:[#allocation5 + $0x90] sm:$0xff] }
  0x3d   :  { %1319 = vmatpush1.bf16.msra.mxu0 %v1318_v8  ;;  %v1448_v17 = vpack.c.bf16 %v89_v15, %v83_v14  ;;  %v82_v20 = vld [vmem:[#allocation5 + $0x70] sm:$0xff]  ;;  %v1322_v21 = vpack.c.bf16 %v86_v19, %v80_v18  ;;  %v88_v22 = vld [vmem:[#allocation5 + $0xa0] sm:$0xff]  ;;  %v93_v23 = vld [vmem:[#allocation5 + $0xc8] sm:$0xff]  ;;  %p1866_p13 = por %p1865_p12, %p1864_p11 }
  0x3e   :  { %1447 = vmatpush1.bf16.msra.mxu1 %v1446_v12  ;;  %v99_v24 = vld [vmem:[#allocation5 + $0xf8] sm:$0xff]  ;;  %1321 = vmatprep.subr.bf16.mxu0 %v1320_v16  ;;  %v1450_v25 = vpack.c.bf16 %v88_v22, %v82_v20  ;;  %v101_v28 = vld [vmem:[#allocation5 + $0x108] sm:$0xff]  ;;  %v92_v29 = vld [vmem:[#allocation5 + $0xc0] sm:$0xff] }
  0x3f   :  { %1449 = vmatprep.subr.bf16.mxu1 %v1448_v17  ;;  %v1324_v26 = vpack.c.bf16 %v99_v24, %v93_v23  ;;  %v95_v27 = vld [vmem:[#allocation5 + $0xd8] sm:$0xff]  ;;  %v98_v31 = vld [vmem:[#allocation5 + $0xf0] sm:$0xff]  ;;  %v100_v33 = vld [vmem:[#allocation5 + $0x100] sm:$0xff]  ;;  %p1867_p0 = pnand %p1866_p13, %p1860_p10 }
  0x40   :  { %v1452_v30 = vpack.c.bf16 %v101_v28, %v95_v27  ;;  %v94_v32 = vld [vmem:[#allocation5 + $0xd0] sm:$0xff]  ;;  %v1326_v34 = vpack.c.bf16 %v98_v31, %v92_v29  ;;  %v105_v35 = vld [vmem:[#allocation5 + $0x128] sm:$0xff]  ;;  %v111_v36 = vld [vmem:[#allocation5 + $0x158] sm:$0xff] }
  0x41   :  { %1323 = vmatpush1.bf16.msra.mxu0 %v1322_v21  ;;  %v107_v37 = vld [vmem:[#allocation5 + $0x138] sm:$0xff]  ;;  %v1454_v38 = vpack.c.bf16 %v100_v33, %v94_v32  ;;  %v1328_v39 = vpack.c.bf16 %v111_v36, %v105_v35  ;;  %v113_v40 = vld [vmem:[#allocation5 + $0x168] sm:$0xff]  ;;  %v104_v41 = vld [vmem:[#allocation5 + $0x120] sm:$0xff] }
  0x42   :  { %1451 = vmatpush1.bf16.msra.mxu1 %v1450_v25  ;;  %1325 = vmatprep.subr.bf16.mxu0 %v1324_v26  ;;  %v110_v42 = vld [vmem:[#allocation5 + $0x150] sm:$0xff]  ;;  %v1456_v43 = vpack.c.bf16 %v113_v40, %v107_v37  ;;  %v112_v45 = vld [vmem:[#allocation5 + $0x160] sm:$0xff]  ;;  %v117_v46 = vld [vmem:[#allocation5 + $0x188] sm:$0xff] }
  0x43   :  { %1453 = vmatprep.subr.bf16.mxu1 %v1452_v30  ;;  %v106_v44 = vld [vmem:[#allocation5 + $0x130] sm:$0xff]  ;;  %v123_v47 = vld [vmem:[#allocation5 + $0x1b8] sm:$0xff]  ;;  %v125_v49 = vld [vmem:[#allocation5 + $0x1c8] sm:$0xff]  ;;  %v1330_v50 = vpack.c.bf16 %v110_v42, %v104_v41 }
  0x44   :  { %v119_v48 = vld [vmem:[#allocation5 + $0x198] sm:$0xff]  ;;  %v1458_v51 = vpack.c.bf16 %v112_v45, %v106_v44  ;;  %v1332_v52 = vpack.c.bf16 %v123_v47, %v117_v46  ;;  %v116_v53 = vld [vmem:[#allocation5 + $0x180] sm:$0xff]  ;;  %v122_v54 = vld [vmem:[#allocation5 + $0x1b0] sm:$0xff] }
  0x45   :  { %1327 = vmatpush1.bf16.msra.mxu0 %v1326_v34  ;;  %v118_v55 = vld [vmem:[#allocation5 + $0x190] sm:$0xff]  ;;  %v1460_v56 = vpack.c.bf16 %v125_v49, %v119_v48  ;;  %v124_v57 = vld [vmem:[#allocation5 + $0x1c0] sm:$0xff]  ;;  %v129_v58 = vld [vmem:[#allocation5 + $0x1e8] sm:$0xff]  ;;  %v1334_v62 = vpack.c.bf16 %v122_v54, %v116_v53 }
  0x46   :  { %1455 = vmatpush1.bf16.msra.mxu1 %v1454_v38  ;;  %1329 = vmatprep.subr.bf16.mxu0 %v1328_v39  ;;  %v135_v59 = vld [vmem:[#allocation5 + $0x218] sm:$0xff]  ;;  %v137_v61 = vld [vmem:[#allocation5 + $0x228] sm:$0xff]  ;;  %v1462_v63 = vpack.c.bf16 %v124_v57, %v118_v55  ;;  %v128_v1 = vld [vmem:[#allocation5 + $0x1e0] sm:$0xff] }
  0x47   :  { %1457 = vmatprep.subr.bf16.mxu1 %v1456_v43  ;;  %v131_v60 = vld [vmem:[#allocation5 + $0x1f8] sm:$0xff]  ;;  %v1336_v0 = vpack.c.bf16 %v135_v59, %v129_v58  ;;  %v134_v2 = vld [vmem:[#allocation5 + $0x210] sm:$0xff]  ;;  %v136_v5 = vld [vmem:[#allocation5 + $0x220] sm:$0xff] }
  0x48   :  { %v130_v3 = vld [vmem:[#allocation5 + $0x1f0] sm:$0xff]  ;;  %v1464_v4 = vpack.c.bf16 %v137_v61, %v131_v60  ;;  %v141_v6 = vld [vmem:[#allocation5 + $0x248] sm:$0xff]  ;;  %v147_v7 = vld [vmem:[#allocation5 + $0x278] sm:$0xff]  ;;  %v1338_v10 = vpack.c.bf16 %v134_v2, %v128_v1 }
  0x49   :  { %1331 = vmatpush1.bf16.msra.mxu0 %v1330_v50  ;;  %v143_v8 = vld [vmem:[#allocation5 + $0x258] sm:$0xff]  ;;  %v149_v9 = vld [vmem:[#allocation5 + $0x288] sm:$0xff]  ;;  %v1466_v11 = vpack.c.bf16 %v136_v5, %v130_v3  ;;  %v1340_v12 = vpack.c.bf16 %v147_v7, %v141_v6  ;;  %v140_v13 = vld [vmem:[#allocation5 + $0x240] sm:$0xff] }
  0x4a   :  { %1459 = vmatpush1.bf16.msra.mxu1 %v1458_v51  ;;  %1333 = vmatprep.subr.bf16.mxu0 %v1332_v52  ;;  %v146_v14 = vld [vmem:[#allocation5 + $0x270] sm:$0xff]  ;;  %v1468_v16 = vpack.c.bf16 %v149_v9, %v143_v8  ;;  %v148_v17 = vld [vmem:[#allocation5 + $0x280] sm:$0xff]  ;;  %v153_v18 = vld [vmem:[#allocation5 + $0x2a8] sm:$0xff] }
  0x4b   :  { %1461 = vmatprep.subr.bf16.mxu1 %v1460_v56  ;;  %v142_v15 = vld [vmem:[#allocation5 + $0x250] sm:$0xff]  ;;  %v159_v19 = vld [vmem:[#allocation5 + $0x2d8] sm:$0xff]  ;;  %v161_v21 = vld [vmem:[#allocation5 + $0x2e8] sm:$0xff]  ;;  %v1342_v22 = vpack.c.bf16 %v146_v14, %v140_v13 }
  0x4c   :  { %v155_v20 = vld [vmem:[#allocation5 + $0x2b8] sm:$0xff]  ;;  %v1470_v23 = vpack.c.bf16 %v148_v17, %v142_v15  ;;  %v1344_v24 = vpack.c.bf16 %v159_v19, %v153_v18  ;;  %v152_v25 = vld [vmem:[#allocation5 + $0x2a0] sm:$0xff]  ;;  %v158_v26 = vld [vmem:[#allocation5 + $0x2d0] sm:$0xff] }
  0x4d   :  { %1335 = vmatpush1.bf16.msra.mxu0 %v1334_v62  ;;  %v154_v27 = vld [vmem:[#allocation5 + $0x2b0] sm:$0xff]  ;;  %v1472_v28 = vpack.c.bf16 %v161_v21, %v155_v20  ;;  %v160_v29 = vld [vmem:[#allocation5 + $0x2e0] sm:$0xff]  ;;  %v165_v30 = vld [vmem:[#allocation5 + $0x308] sm:$0xff]  ;;  %v1346_v34 = vpack.c.bf16 %v158_v26, %v152_v25 }
  0x4e   :  { %1463 = vmatpush1.bf16.msra.mxu1 %v1462_v63  ;;  %1337 = vmatprep.subr.bf16.mxu0 %v1336_v0  ;;  %v171_v31 = vld [vmem:[#allocation5 + $0x338] sm:$0xff]  ;;  %v173_v33 = vld [vmem:[#allocation5 + $0x348] sm:$0xff]  ;;  %v1474_v35 = vpack.c.bf16 %v160_v29, %v154_v27  ;;  %v164_v37 = vld [vmem:[#allocation5 + $0x300] sm:$0xff] }
  0x4f   :  { %1465 = vmatprep.subr.bf16.mxu1 %v1464_v4  ;;  %v167_v32 = vld [vmem:[#allocation5 + $0x318] sm:$0xff]  ;;  %v1348_v36 = vpack.c.bf16 %v171_v31, %v165_v30  ;;  %v170_v38 = vld [vmem:[#allocation5 + $0x330] sm:$0xff]  ;;  %v172_v41 = vld [vmem:[#allocation5 + $0x340] sm:$0xff] }
  0x50   :  { %v166_v39 = vld [vmem:[#allocation5 + $0x310] sm:$0xff]  ;;  %v1476_v40 = vpack.c.bf16 %v173_v33, %v167_v32  ;;  %v177_v42 = vld [vmem:[#allocation5 + $0x368] sm:$0xff]  ;;  %v183_v43 = vld [vmem:[#allocation5 + $0x398] sm:$0xff]  ;;  %v1350_v46 = vpack.c.bf16 %v170_v38, %v164_v37 }
  0x51   :  { %1339 = vmatpush1.bf16.msra.mxu0 %v1338_v10  ;;  %v179_v44 = vld [vmem:[#allocation5 + $0x378] sm:$0xff]  ;;  %v185_v45 = vld [vmem:[#allocation5 + $0x3a8] sm:$0xff]  ;;  %v1478_v47 = vpack.c.bf16 %v172_v41, %v166_v39  ;;  %v1352_v48 = vpack.c.bf16 %v183_v43, %v177_v42  ;;  %v176_v49 = vld [vmem:[#allocation5 + $0x360] sm:$0xff] }
  0x52   :  { %1467 = vmatpush1.bf16.msra.mxu1 %v1466_v11  ;;  %1341 = vmatprep.subr.bf16.mxu0 %v1340_v12  ;;  %v182_v50 = vld [vmem:[#allocation5 + $0x390] sm:$0xff]  ;;  %v1480_v52 = vpack.c.bf16 %v185_v45, %v179_v44  ;;  %v184_v53 = vld [vmem:[#allocation5 + $0x3a0] sm:$0xff]  ;;  %v189_v54 = vld [vmem:[#allocation5 + $0x3c8] sm:$0xff] }
  0x53   :  { %1469 = vmatprep.subr.bf16.mxu1 %v1468_v16  ;;  %v178_v51 = vld [vmem:[#allocation5 + $0x370] sm:$0xff]  ;;  %v195_v55 = vld [vmem:[#allocation5 + $0x3f8] sm:$0xff]  ;;  %v197_v57 = vld [vmem:[#allocation5 + $0x408] sm:$0xff]  ;;  %v1354_v58 = vpack.c.bf16 %v182_v50, %v176_v49 }
  0x54   :  { %v191_v56 = vld [vmem:[#allocation5 + $0x3d8] sm:$0xff]  ;;  %v1482_v59 = vpack.c.bf16 %v184_v53, %v178_v51  ;;  %v1356_v60 = vpack.c.bf16 %v195_v55, %v189_v54  ;;  %v188_v61 = vld [vmem:[#allocation5 + $0x3c0] sm:$0xff]  ;;  %v194_v62 = vld [vmem:[#allocation5 + $0x3f0] sm:$0xff] }
  0x55   :  { %1343 = vmatpush1.bf16.msra.mxu0 %v1342_v22  ;;  %v190_v63 = vld [vmem:[#allocation5 + $0x3d0] sm:$0xff]  ;;  %v1484_v0 = vpack.c.bf16 %v197_v57, %v191_v56  ;;  %v196_v1 = vld [vmem:[#allocation5 + $0x400] sm:$0xff]  ;;  %v201_v2 = vld [vmem:[#allocation5 + $0x428] sm:$0xff]  ;;  %v1358_v6 = vpack.c.bf16 %v194_v62, %v188_v61 }
  0x56   :  { %1471 = vmatpush1.bf16.msra.mxu1 %v1470_v23  ;;  %1345 = vmatprep.subr.bf16.mxu0 %v1344_v24  ;;  %v207_v3 = vld [vmem:[#allocation5 + $0x458] sm:$0xff]  ;;  %v209_v5 = vld [vmem:[#allocation5 + $0x468] sm:$0xff]  ;;  %v200_v7 = vld [vmem:[#allocation5 + $0x420] sm:$0xff]  ;;  %v1486_v8 = vpack.c.bf16 %v196_v1, %v190_v63 }
  0x57   :  { %1473 = vmatprep.subr.bf16.mxu1 %v1472_v28  ;;  %v203_v4 = vld [vmem:[#allocation5 + $0x438] sm:$0xff]  ;;  %v1360_v9 = vpack.c.bf16 %v207_v3, %v201_v2  ;;  %v206_v10 = vld [vmem:[#allocation5 + $0x450] sm:$0xff]  ;;  %v208_v12 = vld [vmem:[#allocation5 + $0x460] sm:$0xff] }
  0x58   :  { %v202_v11 = vld [vmem:[#allocation5 + $0x430] sm:$0xff]  ;;  %v1488_v13 = vpack.c.bf16 %v209_v5, %v203_v4  ;;  %v213_v14 = vld [vmem:[#allocation5 + $0x488] sm:$0xff]  ;;  %v219_v15 = vld [vmem:[#allocation5 + $0x4b8] sm:$0xff]  ;;  %v1362_v19 = vpack.c.bf16 %v206_v10, %v200_v7 }
  0x59   :  { %1347 = vmatpush1.bf16.msra.mxu0 %v1346_v34  ;;  %v1959_v16 = vld [vmem:[#allocation2 + $0x8] sm:$0xff]  ;;  %v215_v17 = vld [vmem:[#allocation5 + $0x498] sm:$0xff]  ;;  %v1490_v20 = vpack.c.bf16 %v208_v12, %v202_v11  ;;  %v1364_v21 = vpack.c.bf16 %v219_v15, %v213_v14  ;;  %v212_v22 = vld [vmem:[#allocation5 + $0x480] sm:$0xff] }
  0x5a   :  { %1475 = vmatpush1.bf16.msra.mxu1 %v1474_v35  ;;  %1349 = vmatprep.subr.bf16.mxu0 %v1348_v36  ;;  %v221_v18 = vld [vmem:[#allocation5 + $0x4c8] sm:$0xff]  ;;  %v218_v23 = vld [vmem:[#allocation5 + $0x4b0] sm:$0xff]  ;;  %v220_v26 = vld [vmem:[#allocation5 + $0x4c0] sm:$0xff] }
  0x5b   :  { %1477 = vmatprep.subr.bf16.mxu1 %v1476_v40  ;;  %516 = vmatprep.mubr.f32.mxu0 %v1959_v16  ;;  %v214_v24 = vld [vmem:[#allocation5 + $0x490] sm:$0xff]  ;;  %v1492_v25 = vpack.c.bf16 %v221_v18, %v215_v17  ;;  %v225_v27 = vld [vmem:[#allocation5 + $0x4e8] sm:$0xff]  ;;  %v231_v28 = vld [vmem:[#allocation5 + $0x518] sm:$0xff]  ;;  %v1366_v31 = vpack.c.bf16 %v218_v23, %v212_v22 }
  0x5c   :  { %682 = vmatprep.mubr.f32.mxu1 %v1959_v16  ;;  %v227_v29 = vld [vmem:[#allocation5 + $0x4f8] sm:$0xff]  ;;  %v233_v30 = vld [vmem:[#allocation5 + $0x528] sm:$0xff]  ;;  %v1494_v32 = vpack.c.bf16 %v220_v26, %v214_v24  ;;  %v1368_v33 = vpack.c.bf16 %v231_v28, %v225_v27  ;;  %v224_v34 = vld [vmem:[#allocation5 + $0x4e0] sm:$0xff] }
  0x5d   :  { %1351 = vmatpush1.bf16.msra.mxu0 %v1350_v46  ;;  %v230_v35 = vld [vmem:[#allocation5 + $0x510] sm:$0xff]  ;;  %v1496_v37 = vpack.c.bf16 %v233_v30, %v227_v29  ;;  %v232_v38 = vld [vmem:[#allocation5 + $0x520] sm:$0xff]  ;;  %v237_v39 = vld [vmem:[#allocation5 + $0x548] sm:$0xff] }
  0x5e   :  { %1479 = vmatpush1.bf16.msra.mxu1 %v1478_v47  ;;  %1353 = vmatprep.subr.bf16.mxu0 %v1352_v48  ;;  %v226_v36 = vld [vmem:[#allocation5 + $0x4f0] sm:$0xff]  ;;  %v243_v40 = vld [vmem:[#allocation5 + $0x578] sm:$0xff]  ;;  %v245_v42 = vld [vmem:[#allocation5 + $0x588] sm:$0xff]  ;;  %v1370_v43 = vpack.c.bf16 %v230_v35, %v224_v34 }
  0x5f   :  { %1481 = vmatprep.subr.bf16.mxu1 %v1480_v52  ;;  %v239_v41 = vld [vmem:[#allocation5 + $0x558] sm:$0xff]  ;;  %v1498_v44 = vpack.c.bf16 %v232_v38, %v226_v36  ;;  %v1372_v45 = vpack.c.bf16 %v243_v40, %v237_v39  ;;  %v236_v46 = vld [vmem:[#allocation5 + $0x540] sm:$0xff]  ;;  %v242_v47 = vld [vmem:[#allocation5 + $0x570] sm:$0xff] }
  0x60   :  { %v238_v48 = vld [vmem:[#allocation5 + $0x550] sm:$0xff]  ;;  %v1500_v49 = vpack.c.bf16 %v245_v42, %v239_v41  ;;  %v244_v50 = vld [vmem:[#allocation5 + $0x580] sm:$0xff]  ;;  %v249_v51 = vld [vmem:[#allocation5 + $0x5a8] sm:$0xff]  ;;  %v1374_v55 = vpack.c.bf16 %v242_v47, %v236_v46 }
  0x61   :  { %1355 = vmatpush1.bf16.msra.mxu0 %v1354_v58  ;;  %v255_v52 = vld [vmem:[#allocation5 + $0x5d8] sm:$0xff]  ;;  %v257_v54 = vld [vmem:[#allocation5 + $0x5e8] sm:$0xff]  ;;  %v1502_v56 = vpack.c.bf16 %v244_v50, %v238_v48  ;;  %v248_v58 = vld [vmem:[#allocation5 + $0x5a0] sm:$0xff] }
  0x62   :  { %1483 = vmatpush1.bf16.msra.mxu1 %v1482_v59  ;;  %1357 = vmatprep.subr.bf16.mxu0 %v1356_v60  ;;  %v251_v53 = vld [vmem:[#allocation5 + $0x5b8] sm:$0xff]  ;;  %v1376_v57 = vpack.c.bf16 %v255_v52, %v249_v51  ;;  %v254_v59 = vld [vmem:[#allocation5 + $0x5d0] sm:$0xff]  ;;  %v256_v62 = vld [vmem:[#allocation5 + $0x5e0] sm:$0xff] }
  0x63   :  { %1485 = vmatprep.subr.bf16.mxu1 %v1484_v0  ;;  %v250_v60 = vld [vmem:[#allocation5 + $0x5b0] sm:$0xff]  ;;  %v1504_v61 = vpack.c.bf16 %v257_v54, %v251_v53  ;;  %v261_v63 = vld [vmem:[#allocation5 + $0x608] sm:$0xff]  ;;  %v267_v0 = vld [vmem:[#allocation5 + $0x638] sm:$0xff]  ;;  %v1378_v3 = vpack.c.bf16 %v254_v59, %v248_v58 }
  0x64   :  { %v263_v1 = vld [vmem:[#allocation5 + $0x618] sm:$0xff]  ;;  %v269_v2 = vld [vmem:[#allocation5 + $0x648] sm:$0xff]  ;;  %v1506_v4 = vpack.c.bf16 %v256_v62, %v250_v60  ;;  %v1380_v5 = vpack.c.bf16 %v267_v0, %v261_v63  ;;  %v266_v7 = vld [vmem:[#allocation5 + $0x630] sm:$0xff] }
  0x65   :  { %1359 = vmatpush1.bf16.msra.mxu0 %v1358_v6  ;;  %v260_v6 = vld [vmem:[#allocation5 + $0x600] sm:$0xff]  ;;  %v273_v11 = vld [vmem:[#allocation5 + $0x668] sm:$0xff]  ;;  %v279_v12 = vld [vmem:[#allocation5 + $0x698] sm:$0xff] }
  0x66   :  { %1487 = vmatpush1.bf16.msra.mxu1 %v1486_v8  ;;  %1361 = vmatprep.subr.bf16.mxu0 %v1360_v9  ;;  %v262_v8 = vld [vmem:[#allocation5 + $0x610] sm:$0xff]  ;;  %v1508_v9 = vpack.c.bf16 %v269_v2, %v263_v1  ;;  %v268_v10 = vld [vmem:[#allocation5 + $0x640] sm:$0xff]  ;;  %v281_v14 = vld [vmem:[#allocation5 + $0x6a8] sm:$0xff]  ;;  %v1382_v17 = vpack.c.bf16 %v266_v7, %v260_v6 }
  0x67   :  { %1489 = vmatprep.subr.bf16.mxu1 %v1488_v13  ;;  %v275_v13 = vld [vmem:[#allocation5 + $0x678] sm:$0xff]  ;;  %v1963_v15 = vld [vmem:[#allocation2] sm:$0xff]  ;;  %v1510_v18 = vpack.c.bf16 %v268_v10, %v262_v8  ;;  %v274_v22 = vld [vmem:[#allocation5 + $0x670] sm:$0xff] }
  0x68   :  { %v1512_v23 = vpack.c.bf16 %v281_v14, %v275_v13  ;;  %v280_v24 = vld [vmem:[#allocation5 + $0x6a0] sm:$0xff]  ;;  %v291_v26 = vld [vmem:[#allocation5 + $0x6f8] sm:$0xff]  ;;  %v293_v28 = vld [vmem:[#allocation5 + $0x708] sm:$0xff] }
  0x69   :  { %1363 = vmatpush1.bf16.msra.mxu0 %v1362_v19  ;;  %v1384_v19 = vpack.c.bf16 %v279_v12, %v273_v11  ;;  %v287_v27 = vld [vmem:[#allocation5 + $0x6d8] sm:$0xff]  ;;  %v1514_v30 = vpack.c.bf16 %v280_v24, %v274_v22  ;;  %v286_v34 = vld [vmem:[#allocation5 + $0x6d0] sm:$0xff]  ;;  %v292_v36 = vld [vmem:[#allocation5 + $0x700] sm:$0xff] }
  0x6a   :  { %1491 = vmatpush1.bf16.msra.mxu1 %v1490_v20  ;;  %1365 = vmatprep.subr.bf16.mxu0 %v1364_v21  ;;  %v272_v20 = vld [vmem:[#allocation5 + $0x660] sm:$0xff]  ;;  %v278_v21 = vld [vmem:[#allocation5 + $0x690] sm:$0xff]  ;;  %v1516_v35 = vpack.c.bf16 %v293_v28, %v287_v27  ;;  %v303_v38 = vld [vmem:[#allocation5 + $0x758] sm:$0xff]  ;;  %v1518_v42 = vpack.c.bf16 %v292_v36, %v286_v34 }
  0x6b   :  { %1493 = vmatprep.subr.bf16.mxu1 %v1492_v25  ;;  %v285_v25 = vld [vmem:[#allocation5 + $0x6c8] sm:$0xff]  ;;  %v1386_v29 = vpack.c.bf16 %v278_v21, %v272_v20  ;;  %v299_v39 = vld [vmem:[#allocation5 + $0x738] sm:$0xff]  ;;  %v298_v46 = vld [vmem:[#allocation5 + $0x730] sm:$0xff] }
  0x6c   :  { %v305_v40 = vld [vmem:[#allocation5 + $0x768] sm:$0xff]  ;;  %v304_v48 = vld [vmem:[#allocation5 + $0x760] sm:$0xff]  ;;  %v315_v50 = vld [vmem:[#allocation5 + $0x7b8] sm:$0xff] }
  0x6d   :  { %1367 = vmatpush1.bf16.msra.mxu0 %v1366_v31  ;;  %v1388_v31 = vpack.c.bf16 %v291_v26, %v285_v25  ;;  %v1520_v47 = vpack.c.bf16 %v305_v40, %v299_v39  ;;  %v311_v51 = vld [vmem:[#allocation5 + $0x798] sm:$0xff]  ;;  %v317_v52 = vld [vmem:[#allocation5 + $0x7c8] sm:$0xff]  ;;  %v1522_v54 = vpack.c.bf16 %v304_v48, %v298_v46  ;;  %v310_v58 = vld [vmem:[#allocation5 + $0x790] sm:$0xff] }
  0x6e   :  { %1495 = vmatpush1.bf16.msra.mxu1 %v1494_v32  ;;  %1369 = vmatprep.subr.bf16.mxu0 %v1368_v33  ;;  %v284_v32 = vld [vmem:[#allocation5 + $0x6c0] sm:$0xff]  ;;  %v290_v33 = vld [vmem:[#allocation5 + $0x6f0] sm:$0xff]  ;;  %v1524_v59 = vpack.c.bf16 %v317_v52, %v311_v51  ;;  %v327_v62 = vld [vmem:[#allocation5 + $0x818] sm:$0xff] }
  0x6f   :  { %1497 = vmatprep.subr.bf16.mxu1 %v1496_v37  ;;  %v297_v37 = vld [vmem:[#allocation5 + $0x728] sm:$0xff]  ;;  %v1390_v41 = vpack.c.bf16 %v290_v33, %v284_v32  ;;  %v316_v60 = vld [vmem:[#allocation5 + $0x7c0] sm:$0xff]  ;;  %v323_v63 = vld [vmem:[#allocation5 + $0x7f8] sm:$0xff] }
  0x70   :  { %v329_v0 = vld [vmem:[#allocation5 + $0x828] sm:$0xff]  ;;  %v320_v2 = vld [vmem:[#allocation5 + $0x7e0] sm:$0xff]  ;;  %v326_v6 = vld [vmem:[#allocation5 + $0x810] sm:$0xff] }
  0x71   :  { %1371 = vmatpush1.bf16.msra.mxu0 %v1370_v43  ;;  %v1392_v43 = vpack.c.bf16 %v303_v38, %v297_v37  ;;  %v322_v7 = vld [vmem:[#allocation5 + $0x7f0] sm:$0xff]  ;;  %v1969_v8 = vld [vmem:[#allocation2 + $0x20] sm:$0xff]  ;;  %v333_v11 = vld [vmem:[#allocation5 + $0x848] sm:$0xff] }
  0x72   :  { %1499 = vmatpush1.bf16.msra.mxu1 %v1498_v44  ;;  %1373 = vmatprep.subr.bf16.mxu0 %v1372_v45  ;;  %v296_v44 = vld [vmem:[#allocation5 + $0x720] sm:$0xff]  ;;  %v302_v45 = vld [vmem:[#allocation5 + $0x750] sm:$0xff]  ;;  %v339_v12 = vld [vmem:[#allocation5 + $0x878] sm:$0xff] }
  0x73   :  { %1501 = vmatprep.subr.bf16.mxu1 %v1500_v49  ;;  %v309_v49 = vld [vmem:[#allocation5 + $0x788] sm:$0xff]  ;;  %v1394_v53 = vpack.c.bf16 %v302_v45, %v296_v44  ;;  %v328_v10 = vld [vmem:[#allocation5 + $0x820] sm:$0xff]  ;;  %v335_v13 = vld [vmem:[#allocation5 + $0x858] sm:$0xff]  ;;  %v1404_v21 = vpack.c.bf16 %v339_v12, %v333_v11 }
  0x74   :  { %v341_v14 = vld [vmem:[#allocation5 + $0x888] sm:$0xff]  ;;  %v1530_v20 = vpack.c.bf16 %v328_v10, %v322_v7  ;;  %v332_v22 = vld [vmem:[#allocation5 + $0x840] sm:$0xff]  ;;  %v334_v24 = vld [vmem:[#allocation5 + $0x850] sm:$0xff] }
  0x75   :  { %1375 = vmatpush1.bf16.msra.mxu0 %v1374_v55  ;;  %v1396_v55 = vpack.c.bf16 %v315_v50, %v309_v49  ;;  %v1532_v25 = vpack.c.bf16 %v341_v14, %v335_v13  ;;  %v340_v26 = vld [vmem:[#allocation5 + $0x880] sm:$0xff]  ;;  %v345_v27 = vld [vmem:[#allocation5 + $0x8a8] sm:$0xff]  ;;  %v351_v28 = vld [vmem:[#allocation5 + $0x8d8] sm:$0xff] }
  0x76   :  { %1503 = vmatpush1.bf16.msra.mxu1 %v1502_v56  ;;  %1377 = vmatprep.subr.bf16.mxu0 %v1376_v57  ;;  %v308_v56 = vld [vmem:[#allocation5 + $0x780] sm:$0xff]  ;;  %v314_v57 = vld [vmem:[#allocation5 + $0x7b0] sm:$0xff]  ;;  %v1534_v33 = vpack.c.bf16 %v340_v26, %v334_v24  ;;  %v1408_v34 = vpack.c.bf16 %v351_v28, %v345_v27  ;;  %v357_v40 = vld [vmem:[#allocation5 + $0x908] sm:$0xff] }
  0x77   :  { %1505 = vmatprep.subr.bf16.mxu1 %v1504_v61  ;;  %v321_v61 = vld [vmem:[#allocation5 + $0x7e8] sm:$0xff]  ;;  %v1398_v1 = vpack.c.bf16 %v314_v57, %v308_v56  ;;  %v350_v36 = vld [vmem:[#allocation5 + $0x8d0] sm:$0xff]  ;;  %v352_v39 = vld [vmem:[#allocation5 + $0x8e0] sm:$0xff] }
  0x78   :  { %v346_v37 = vld [vmem:[#allocation5 + $0x8b0] sm:$0xff]  ;;  %v364_v51 = vld [vmem:[#allocation5 + $0x940] sm:$0xff]  ;;  %v369_v52 = vld [vmem:[#allocation5 + $0x968] sm:$0xff] }
  0x79   :  { %1379 = vmatpush1.bf16.msra.mxu0 %v1378_v3  ;;  %v1967_v3 = vld [vmem:[#allocation2 + $0x28] sm:$0xff]  ;;  %v1538_v45 = vpack.c.bf16 %v352_v39, %v346_v37  ;;  %v362_v48 = vld [vmem:[#allocation5 + $0x930] sm:$0xff]  ;;  %v388_v13 = vld [vmem:[#allocation5 + $0xa00] sm:$0xff] }
  0x7a   :  { %1507 = vmatpush1.bf16.msra.mxu1 %v1506_v4  ;;  %1381 = vmatprep.subr.bf16.mxu0 %v1380_v5  ;;  %v1526_v4 = vpack.c.bf16 %v316_v60, %v310_v58  ;;  %v1400_v5 = vpack.c.bf16 %v327_v62, %v321_v61  ;;  %v358_v49 = vld [vmem:[#allocation5 + $0x910] sm:$0xff]  ;;  %v393_v14 = vld [vmem:[#allocation5 + $0xa28] sm:$0xff] }
  0x7b   :  { %1509 = vmatprep.subr.bf16.mxu1 %v1508_v9  ;;  %v1528_v9 = vpack.c.bf16 %v329_v0, %v323_v63  ;;  %v1542_v57 = vpack.c.bf16 %v364_v51, %v358_v49  ;;  %v374_v60 = vld [vmem:[#allocation5 + $0x990] sm:$0xff]  ;;  %v376_v63 = vld [vmem:[#allocation5 + $0x9a0] sm:$0xff]  ;;  %v381_v0 = vld [vmem:[#allocation5 + $0x9c8] sm:$0xff] }
  0x7c   :  { %517 = vmatmul.mubr.f32.vlgmr.msra.gmra.mrb[0].mxu0 %v1963_v15  ;;  %v370_v61 = vld [vmem:[#allocation5 + $0x970] sm:$0xff] }
  0x7d   :  { %1383 = vmatpush1.bf16.msra.mxu0 %v1382_v17  ;;  %683 = vmatmul.mubr.f32.vlgmr.msra.gmra.mrb[0].mxu1 %v1963_v15  ;;  %v1402_v17 = vpack.c.bf16 %v326_v6, %v320_v2  ;;  %v383_v2 = vld [vmem:[#allocation5 + $0x9d8] sm:$0xff]  ;;  %v1546_v6 = vpack.c.bf16 %v376_v63, %v370_v61  ;;  %v386_v10 = vld [vmem:[#allocation5 + $0x9f0] sm:$0xff] }
  0x7e   :  { %1511 = vmatpush1.bf16.msra.mxu1 %v1510_v18  ;;  %1385 = vmatprep.subr.bf16.mxu0 %v1384_v19  ;;  %v1975_v18 = vld [vmem:[#allocation2 + $0x48] sm:$0xff]  ;;  %v1977_v19 = vld [vmem:[#allocation2 + $0x40] sm:$0xff]  ;;  %v382_v11 = vld [vmem:[#allocation5 + $0x9d0] sm:$0xff] }
  0x7f   :  { %1513 = vmatprep.subr.bf16.mxu1 %v1512_v23  ;;  %522 = vmatprep.mubr.f32.mxu0 %v1967_v3  ;;  %v338_v23 = vld [vmem:[#allocation5 + $0x870] sm:$0xff] }
  0x80   :  { %688 = vmatprep.mubr.f32.mxu1 %v1967_v3  ;;  %523 = vmatmul.mubr.f32.gmra.mrb[2].mxu0 %v1969_v8  ;;  %v1406_v32 = vpack.c.bf16 %v338_v23, %v332_v22  ;;  %v1550_v23 = vpack.c.bf16 %v388_v13, %v382_v11  ;;  %v398_v26 = vld [vmem:[#allocation5 + $0xa50] sm:$0xff] }
  0x81   :  { %1387 = vmatpush1.bf16.msra.mxu0 %v1386_v29  ;;  %689 = vmatmul.mubr.f32.gmra.mrb[2].mxu1 %v1969_v8  ;;  %v347_v29 = vld [vmem:[#allocation5 + $0x8b8] sm:$0xff]  ;;  %v394_v27 = vld [vmem:[#allocation5 + $0xa30] sm:$0xff] }
  0x82   :  { %1515 = vmatpush1.bf16.msra.mxu1 %v1514_v30  ;;  %1389 = vmatprep.subr.bf16.mxu0 %v1388_v31  ;;  %v353_v30 = vld [vmem:[#allocation5 + $0x8e8] sm:$0xff]  ;;  %v1982_v31 = vld [vmem:[#allocation2 + $0x18] sm:$0xff]  ;;  %v410_v39 = vld [vmem:[#allocation5 + $0xab0] sm:$0xff] }
  0x83   :  { %1517 = vmatprep.subr.bf16.mxu1 %v1516_v35  ;;  %528 = vmatprep.mubr.f32.mxu0 %v1975_v18  ;;  %v344_v35 = vld [vmem:[#allocation5 + $0x8a0] sm:$0xff]  ;;  %v1536_v38 = vpack.c.bf16 %v353_v30, %v347_v29  ;;  %v405_v30 = vld [vmem:[#allocation5 + $0xa88] sm:$0xff]  ;;  %v422_v51 = vld [vmem:[#allocation5 + $0xb10] sm:$0xff] }
  0x84   :  { %694 = vmatprep.mubr.f32.mxu1 %v1975_v18  ;;  %529 = vmatmul.mubr.f32.gmra.mrb[4].mxu0 %v1977_v19  ;;  %v1410_v44 = vpack.c.bf16 %v350_v36, %v344_v35  ;;  %v400_v29 = vld [vmem:[#allocation5 + $0xa60] sm:$0xff]  ;;  %v434_v63 = vld [vmem:[#allocation5 + $0xb70] sm:$0xff] }
  0x85   :  { %1391 = vmatpush1.bf16.msra.mxu0 %v1390_v41  ;;  %695 = vmatmul.mubr.f32.gmra.mrb[4].mxu1 %v1977_v19  ;;  %v363_v41 = vld [vmem:[#allocation5 + $0x938] sm:$0xff]  ;;  %v1554_v36 = vpack.c.bf16 %v400_v29, %v394_v27  ;;  %v446_v13 = vld [vmem:[#allocation5 + $0xbd0] sm:$0xff] }
  0x86   :  { %1519 = vmatpush1.bf16.msra.mxu1 %v1518_v42  ;;  %1393 = vmatprep.subr.bf16.mxu0 %v1392_v43  ;;  %v359_v42 = vld [vmem:[#allocation5 + $0x918] sm:$0xff]  ;;  %v365_v43 = vld [vmem:[#allocation5 + $0x948] sm:$0xff]  ;;  %v1412_v46 = vpack.c.bf16 %v363_v41, %v357_v40  ;;  %v406_v40 = vld [vmem:[#allocation5 + $0xa90] sm:$0xff] }
  0x87   :  { %1521 = vmatprep.subr.bf16.mxu1 %v1520_v47  ;;  %599 = vmatprep.mubr.f32.mxu0 %v1982_v31  ;;  %v356_v47 = vld [vmem:[#allocation5 + $0x900] sm:$0xff]  ;;  %v1540_v50 = vpack.c.bf16 %v365_v43, %v359_v42  ;;  %v417_v43 = vld [vmem:[#allocation5 + $0xae8] sm:$0xff]  ;;  %v78_v27 = vld [vmem:[#allocation5 + $0x50] sm:$0xff] }
  0x88   :  { %765 = vmatprep.mubr.f32.mxu1 %v1982_v31  ;;  %v1414_v56 = vpack.c.bf16 %v362_v48, %v356_v47  ;;  %v412_v42 = vld [vmem:[#allocation5 + $0xac0] sm:$0xff]  ;;  %v91_v29 = vld [vmem:[#allocation5 + $0xb8] sm:$0xff] }
  0x89   :  { %1395 = vmatpush1.bf16.msra.mxu0 %v1394_v53  ;;  %v375_v53 = vld [vmem:[#allocation5 + $0x998] sm:$0xff]  ;;  %v1558_v48 = vpack.c.bf16 %v412_v42, %v406_v40  ;;  %v102_v42 = vld [vmem:[#allocation5 + $0x110] sm:$0xff] }
  0x8a   :  { %1523 = vmatpush1.bf16.msra.mxu1 %v1522_v54  ;;  %1397 = vmatprep.subr.bf16.mxu0 %v1396_v55  ;;  %v371_v54 = vld [vmem:[#allocation5 + $0x978] sm:$0xff]  ;;  %v377_v55 = vld [vmem:[#allocation5 + $0x9a8] sm:$0xff]  ;;  %v1416_v58 = vpack.c.bf16 %v375_v53, %v369_v52  ;;  %v418_v52 = vld [vmem:[#allocation5 + $0xaf0] sm:$0xff] }
  0x8b   :  { %1525 = vmatprep.subr.bf16.mxu1 %v1524_v59  ;;  %v368_v59 = vld [vmem:[#allocation5 + $0x960] sm:$0xff]  ;;  %v1544_v62 = vpack.c.bf16 %v377_v55, %v371_v54  ;;  %v429_v55 = vld [vmem:[#allocation5 + $0xb48] sm:$0xff] }
  0x8c   :  { %v424_v54 = vld [vmem:[#allocation5 + $0xb20] sm:$0xff] }
  0x8d   :  { %1399 = vmatpush1.bf16.msra.mxu0 %v1398_v1  ;;  %v387_v1 = vld [vmem:[#allocation5 + $0x9f8] sm:$0xff] }
  0x8e   :  { %1527 = vmatpush1.bf16.msra.mxu1 %v1526_v4  ;;  %1401 = vmatprep.subr.bf16.mxu0 %v1400_v5  ;;  %v389_v4 = vld [vmem:[#allocation5 + $0xa08] sm:$0xff]  ;;  %v1418_v5 = vpack.c.bf16 %v374_v60, %v368_v59  ;;  %v1420_v7 = vpack.c.bf16 %v387_v1, %v381_v0  ;;  %v1562_v60 = vpack.c.bf16 %v424_v54, %v418_v52  ;;  %v430_v0 = vld [vmem:[#allocation5 + $0xb50] sm:$0xff] }
  0x8f   :  { %1529 = vmatprep.subr.bf16.mxu1 %v1528_v9  ;;  %v380_v9 = vld [vmem:[#allocation5 + $0x9c0] sm:$0xff]  ;;  %v1548_v12 = vpack.c.bf16 %v389_v4, %v383_v2  ;;  %v441_v4 = vld [vmem:[#allocation5 + $0xba8] sm:$0xff] }
  0x90   :  { %v1422_v22 = vpack.c.bf16 %v386_v10, %v380_v9  ;;  %v436_v2 = vld [vmem:[#allocation5 + $0xb80] sm:$0xff]  ;;  %v121_v52 = vld [vmem:[#allocation5 + $0x1a8] sm:$0xff] }
  0x91   :  { %1403 = vmatpush1.bf16.msra.mxu0 %v1402_v17  ;;  %v399_v17 = vld [vmem:[#allocation5 + $0xa58] sm:$0xff]  ;;  %v1566_v10 = vpack.c.bf16 %v436_v2, %v430_v0  ;;  %v145_v0 = vld [vmem:[#allocation5 + $0x268] sm:$0xff] }
  0x92   :  { %1531 = vmatpush1.bf16.msra.mxu1 %v1530_v20  ;;  %1405 = vmatprep.subr.bf16.mxu0 %v1404_v21  ;;  %v395_v20 = vld [vmem:[#allocation5 + $0xa38] sm:$0xff]  ;;  %v401_v21 = vld [vmem:[#allocation5 + $0xa68] sm:$0xff]  ;;  %v1424_v24 = vpack.c.bf16 %v399_v17, %v393_v14  ;;  %v442_v14 = vld [vmem:[#allocation5 + $0xbb0] sm:$0xff] }
  0x93   :  { %1533 = vmatprep.subr.bf16.mxu1 %v1532_v25  ;;  %v392_v25 = vld [vmem:[#allocation5 + $0xa20] sm:$0xff]  ;;  %v1552_v28 = vpack.c.bf16 %v401_v21, %v395_v20  ;;  %v73_v21 = vld [vmem:[#allocation5 + $0x28] sm:$0xff] }
  0x94   :  { %v1426_v35 = vpack.c.bf16 %v398_v26, %v392_v25  ;;  %v448_v20 = vld [vmem:[#allocation5 + $0xbe0] sm:$0xff] }
  0x95   :  { %1407 = vmatpush1.bf16.msra.mxu0 %v1406_v32  ;;  %v411_v32 = vld [vmem:[#allocation5 + $0xab8] sm:$0xff]  ;;  %v72_v26 = vld [vmem:[#allocation5 + $0x20] sm:$0xff] }
  0x96   :  { %1535 = vmatpush1.bf16.msra.mxu1 %v1534_v33  ;;  %1409 = vmatprep.subr.bf16.mxu0 %v1408_v34  ;;  %v407_v33 = vld [vmem:[#allocation5 + $0xa98] sm:$0xff]  ;;  %v413_v34 = vld [vmem:[#allocation5 + $0xac8] sm:$0xff]  ;;  %v1428_v37 = vpack.c.bf16 %v411_v32, %v405_v30  ;;  %v1987_v30 = vld [vmem:[#allocation2 + $0x10] sm:$0xff]  ;;  %v1574_v32 = vpack.c.bf16 %v78_v27, %v72_v26 }
  0x97   :  { %1537 = vmatprep.subr.bf16.mxu1 %v1536_v38  ;;  %v404_v38 = vld [vmem:[#allocation5 + $0xa80] sm:$0xff]  ;;  %v1556_v41 = vpack.c.bf16 %v413_v34, %v407_v33  ;;  %v90_v34 = vld [vmem:[#allocation5 + $0xb0] sm:$0xff] }
  0x98   :  { %v1430_v47 = vpack.c.bf16 %v410_v39, %v404_v38  ;;  %v84_v33 = vld [vmem:[#allocation5 + $0x80] sm:$0xff]  ;;  %v103_v38 = vld [vmem:[#allocation5 + $0x118] sm:$0xff]  ;;  %v1993_v39 = vld [vmem:[#allocation2 + $0x30] sm:$0xff] }
  0x99   :  { %1411 = vmatpush1.bf16.msra.mxu0 %v1410_v44  ;;  %v423_v44 = vld [vmem:[#allocation5 + $0xb18] sm:$0xff]  ;;  %v1578_v40 = vpack.c.bf16 %v90_v34, %v84_v33  ;;  %v180_v27 = vld [vmem:[#allocation5 + $0x380] sm:$0xff] }
  0x9a   :  { %1539 = vmatpush1.bf16.msra.mxu1 %v1538_v45  ;;  %1413 = vmatprep.subr.bf16.mxu0 %v1412_v46  ;;  %v419_v45 = vld [vmem:[#allocation5 + $0xaf8] sm:$0xff]  ;;  %v425_v46 = vld [vmem:[#allocation5 + $0xb28] sm:$0xff]  ;;  %v1432_v49 = vpack.c.bf16 %v423_v44, %v417_v43 }
  0x9b   :  { %1541 = vmatprep.subr.bf16.mxu1 %v1540_v50  ;;  %v416_v50 = vld [vmem:[#allocation5 + $0xae0] sm:$0xff]  ;;  %v1560_v53 = vpack.c.bf16 %v425_v46, %v419_v45  ;;  %v1997_v43 = vld [vmem:[#allocation2 + $0x58] sm:$0xff]  ;;  %v109_v45 = vld [vmem:[#allocation5 + $0x148] sm:$0xff] }
  0x9c   :  { %v1434_v59 = vpack.c.bf16 %v422_v51, %v416_v50  ;;  %v115_v46 = vld [vmem:[#allocation5 + $0x178] sm:$0xff]  ;;  %v108_v50 = vld [vmem:[#allocation5 + $0x140] sm:$0xff]  ;;  %v114_v51 = vld [vmem:[#allocation5 + $0x170] sm:$0xff] }
  0x9d   :  { %1415 = vmatpush1.bf16.msra.mxu0 %v1414_v56  ;;  %v435_v56 = vld [vmem:[#allocation5 + $0xb78] sm:$0xff]  ;;  %v1586_v54 = vpack.c.bf16 %v114_v51, %v108_v50  ;;  %v216_v51 = vld [vmem:[#allocation5 + $0x4a0] sm:$0xff] }
  0x9e   :  { %1543 = vmatpush1.bf16.msra.mxu1 %v1542_v57  ;;  %1417 = vmatprep.subr.bf16.mxu0 %v1416_v58  ;;  %v431_v57 = vld [vmem:[#allocation5 + $0xb58] sm:$0xff]  ;;  %v437_v58 = vld [vmem:[#allocation5 + $0xb88] sm:$0xff]  ;;  %v1436_v61 = vpack.c.bf16 %v435_v56, %v429_v55  ;;  %v120_v56 = vld [vmem:[#allocation5 + $0x1a0] sm:$0xff] }
  0x9f   :  { %1545 = vmatprep.subr.bf16.mxu1 %v1544_v62  ;;  %v428_v62 = vld [vmem:[#allocation5 + $0xb40] sm:$0xff]  ;;  %v1564_v1 = vpack.c.bf16 %v437_v58, %v431_v57  ;;  %v126_v57 = vld [vmem:[#allocation5 + $0x1d0] sm:$0xff]  ;;  %v133_v58 = vld [vmem:[#allocation5 + $0x208] sm:$0xff] }
  0xa0   :  { %v1438_v9 = vpack.c.bf16 %v434_v63, %v428_v62  ;;  %v132_v62 = vld [vmem:[#allocation5 + $0x200] sm:$0xff]  ;;  %v138_v63 = vld [vmem:[#allocation5 + $0x230] sm:$0xff] }
  0xa1   :  { %1419 = vmatpush1.bf16.msra.mxu0 %v1418_v5  ;;  %v447_v5 = vld [vmem:[#allocation5 + $0xbd8] sm:$0xff]  ;;  %v1594_v2 = vpack.c.bf16 %v138_v63, %v132_v62  ;;  %v240_v63 = vld [vmem:[#allocation5 + $0x560] sm:$0xff] }
  0xa2   :  { %1547 = vmatpush1.bf16.msra.mxu1 %v1546_v6  ;;  %1421 = vmatprep.subr.bf16.mxu0 %v1420_v7  ;;  %v443_v6 = vld [vmem:[#allocation5 + $0xbb8] sm:$0xff]  ;;  %v449_v7 = vld [vmem:[#allocation5 + $0xbe8] sm:$0xff]  ;;  %v1440_v11 = vpack.c.bf16 %v447_v5, %v441_v4  ;;  %v144_v5 = vld [vmem:[#allocation5 + $0x260] sm:$0xff] }
  0xa3   :  { %1549 = vmatprep.subr.bf16.mxu1 %v1548_v12  ;;  %v440_v12 = vld [vmem:[#allocation5 + $0xba0] sm:$0xff]  ;;  %v1568_v17 = vpack.c.bf16 %v449_v7, %v443_v6  ;;  %v150_v6 = vld [vmem:[#allocation5 + $0x290] sm:$0xff]  ;;  %v157_v7 = vld [vmem:[#allocation5 + $0x2c8] sm:$0xff] }
  0xa5   :  { %1423 = vmatpush1.bf16.msra.mxu0 %v1422_v22  ;;  %v79_v22 = vld [vmem:[#allocation5 + $0x58] sm:$0xff] }
  0xa6   :  { %1551 = vmatpush1.bf16.msra.mxu1 %v1550_v23  ;;  %1425 = vmatprep.subr.bf16.mxu0 %v1424_v24  ;;  %v1442_v23 = vpack.c.bf16 %v446_v13, %v440_v12  ;;  %v1570_v24 = vpack.c.bf16 %v448_v20, %v442_v14  ;;  %v1572_v25 = vpack.c.bf16 %v79_v22, %v73_v21  ;;  %v162_v12 = vld [vmem:[#allocation5 + $0x2f0] sm:$0xff]  ;;  %v169_v13 = vld [vmem:[#allocation5 + $0x328] sm:$0xff]  ;;  %v175_v14 = vld [vmem:[#allocation5 + $0x358] sm:$0xff] }
  0xa7   :  { %1553 = vmatprep.subr.bf16.mxu1 %v1552_v28  ;;  %v85_v28 = vld [vmem:[#allocation5 + $0x88] sm:$0xff]  ;;  %v1604_v20 = vpack.c.bf16 %v175_v14, %v169_v13  ;;  %v168_v21 = vld [vmem:[#allocation5 + $0x320] sm:$0xff]  ;;  %v174_v22 = vld [vmem:[#allocation5 + $0x350] sm:$0xff] }
  0xa8   :  { %v270_v13 = vld [vmem:[#allocation5 + $0x650] sm:$0xff]  ;;  %v277_v14 = vld [vmem:[#allocation5 + $0x688] sm:$0xff] }
  0xa9   :  { %1427 = vmatpush1.bf16.msra.mxu0 %v1426_v35  ;;  %v1989_v35 = vld [vmem:[#allocation2 + $0x38] sm:$0xff] }
  0xaa   :  { %1555 = vmatpush1.bf16.msra.mxu1 %v1554_v36  ;;  %1429 = vmatprep.subr.bf16.mxu0 %v1428_v37  ;;  %v1576_v36 = vpack.c.bf16 %v91_v29, %v85_v28  ;;  %v97_v37 = vld [vmem:[#allocation5 + $0xe8] sm:$0xff]  ;;  %v186_v28 = vld [vmem:[#allocation5 + $0x3b0] sm:$0xff] }
  0xab   :  { %1557 = vmatprep.subr.bf16.mxu1 %v1556_v41  ;;  %v96_v41 = vld [vmem:[#allocation5 + $0xe0] sm:$0xff]  ;;  %v1580_v44 = vpack.c.bf16 %v103_v38, %v97_v37  ;;  %v193_v29 = vld [vmem:[#allocation5 + $0x3e8] sm:$0xff]  ;;  %v1610_v33 = vpack.c.bf16 %v186_v28, %v180_v27  ;;  %v198_v37 = vld [vmem:[#allocation5 + $0x410] sm:$0xff] }
  0xac   :  { %v205_v38 = vld [vmem:[#allocation5 + $0x448] sm:$0xff]  ;;  %v288_v28 = vld [vmem:[#allocation5 + $0x6e0] sm:$0xff] }
  0xad   :  { %1431 = vmatpush1.bf16.msra.mxu0 %v1430_v47  ;;  %v2001_v47 = vld [vmem:[#allocation2 + $0x50] sm:$0xff] }
  0xae   :  { %1559 = vmatpush1.bf16.msra.mxu1 %v1558_v48  ;;  %1433 = vmatprep.subr.bf16.mxu0 %v1432_v49  ;;  %v1582_v48 = vpack.c.bf16 %v102_v42, %v96_v41  ;;  %v1584_v49 = vpack.c.bf16 %v115_v46, %v109_v45  ;;  %v210_v45 = vld [vmem:[#allocation5 + $0x470] sm:$0xff]  ;;  %v217_v46 = vld [vmem:[#allocation5 + $0x4a8] sm:$0xff] }
  0xaf   :  { %1561 = vmatprep.subr.bf16.mxu1 %v1560_v53  ;;  %v127_v53 = vld [vmem:[#allocation5 + $0x1d8] sm:$0xff] }
  0xb0   :  { %v1588_v55 = vpack.c.bf16 %v127_v53, %v121_v52  ;;  %v222_v52 = vld [vmem:[#allocation5 + $0x4d0] sm:$0xff]  ;;  %v229_v53 = vld [vmem:[#allocation5 + $0x508] sm:$0xff] }
  0xb1   :  { %1435 = vmatpush1.bf16.msra.mxu0 %v1434_v59  ;;  %v139_v59 = vld [vmem:[#allocation5 + $0x238] sm:$0xff] }
  0xb2   :  { %1563 = vmatpush1.bf16.msra.mxu1 %v1562_v60  ;;  %1437 = vmatprep.subr.bf16.mxu0 %v1436_v61  ;;  %v1590_v60 = vpack.c.bf16 %v126_v57, %v120_v56  ;;  %v1592_v61 = vpack.c.bf16 %v139_v59, %v133_v58  ;;  %v228_v57 = vld [vmem:[#allocation5 + $0x500] sm:$0xff]  ;;  %v234_v58 = vld [vmem:[#allocation5 + $0x530] sm:$0xff]  ;;  %v241_v59 = vld [vmem:[#allocation5 + $0x568] sm:$0xff] }
  0xb3   :  { %1565 = vmatprep.subr.bf16.mxu1 %v1564_v1  ;;  %v151_v1 = vld [vmem:[#allocation5 + $0x298] sm:$0xff] }
  0xb4   :  { %v1596_v4 = vpack.c.bf16 %v151_v1, %v145_v0  ;;  %v246_v0 = vld [vmem:[#allocation5 + $0x590] sm:$0xff]  ;;  %v253_v1 = vld [vmem:[#allocation5 + $0x5c8] sm:$0xff] }
  0xb5   :  { %1439 = vmatpush1.bf16.msra.mxu0 %v1438_v9  ;;  %v163_v9 = vld [vmem:[#allocation5 + $0x2f8] sm:$0xff] }
  0xb6   :  { %1567 = vmatpush1.bf16.msra.mxu1 %v1566_v10  ;;  %1441 = vmatprep.subr.bf16.mxu0 %v1440_v11  ;;  %v1600_v10 = vpack.c.bf16 %v163_v9, %v157_v7  ;;  %v156_v11 = vld [vmem:[#allocation5 + $0x2c0] sm:$0xff]  ;;  %v258_v7 = vld [vmem:[#allocation5 + $0x5f0] sm:$0xff]  ;;  %v265_v9 = vld [vmem:[#allocation5 + $0x628] sm:$0xff] }
  0xb7   :  { %1569 = vmatprep.subr.bf16.mxu1 %v1568_v17  ;;  %v1602_v17 = vpack.c.bf16 %v162_v12, %v156_v11  ;;  %v264_v12 = vld [vmem:[#allocation5 + $0x620] sm:$0xff] }
  0xb9   :  { %1443 = vmatpush1.bf16.msra.mxu0 %v1442_v23  ;;  %v181_v23 = vld [vmem:[#allocation5 + $0x388] sm:$0xff] }
  0xba   :  { %1571 = vmatpush1.bf16.msra.mxu1 %v1570_v24  ;;  %1573 = vmatprep.subr.bf16.mxu0 %v1572_v25  ;;  %v187_v24 = vld [vmem:[#allocation5 + $0x3b8] sm:$0xff]  ;;  %v1606_v25 = vpack.c.bf16 %v174_v22, %v168_v21  ;;  %v276_v22 = vld [vmem:[#allocation5 + $0x680] sm:$0xff] }
  0xbb   :  { %v1608_v26 = vpack.c.bf16 %v187_v24, %v181_v23  ;;  %v282_v23 = vld [vmem:[#allocation5 + $0x6b0] sm:$0xff]  ;;  %v289_v24 = vld [vmem:[#allocation5 + $0x6e8] sm:$0xff] }
  0xbc   :  { %600 = vmatmul.mubr.f32.vlgmr.msra.gmra.mrb[0].mxu0 %v1987_v30 }
  0xbd   :  { %766 = vmatmul.mubr.f32.vlgmr.msra.gmra.mrb[0].mxu1 %v1987_v30  ;;  %1575 = vmatpush1.bf16.msra.mxu0 %v1574_v32  ;;  %v199_v32 = vld [vmem:[#allocation5 + $0x418] sm:$0xff] }
  0xbe   :  { %605 = vmatprep.mubr.f32.mxu0 %v1989_v35  ;;  %771 = vmatprep.mubr.f32.mxu1 %v1989_v35  ;;  %v1612_v34 = vpack.c.bf16 %v199_v32, %v193_v29  ;;  %v294_v29 = vld [vmem:[#allocation5 + $0x710] sm:$0xff]  ;;  %v301_v32 = vld [vmem:[#allocation5 + $0x748] sm:$0xff] }
  0xbf   :  { %1577 = vmatprep.subr.bf16.mxu0 %v1576_v36  ;;  %v192_v36 = vld [vmem:[#allocation5 + $0x3e0] sm:$0xff] }
  0xc0   :  { %606 = vmatmul.mubr.f32.gmra.mrb[2].mxu0 %v1993_v39  ;;  %v1614_v41 = vpack.c.bf16 %v198_v37, %v192_v36  ;;  %v300_v37 = vld [vmem:[#allocation5 + $0x740] sm:$0xff] }
  0xc1   :  { %772 = vmatmul.mubr.f32.gmra.mrb[2].mxu1 %v1993_v39  ;;  %1579 = vmatpush1.bf16.msra.mxu0 %v1578_v40  ;;  %v211_v40 = vld [vmem:[#allocation5 + $0x478] sm:$0xff] }
  0xc2   :  { %611 = vmatprep.mubr.f32.mxu0 %v1997_v43  ;;  %777 = vmatprep.mubr.f32.mxu1 %v1997_v43  ;;  %v1616_v42 = vpack.c.bf16 %v211_v40, %v205_v38  ;;  %v313_v38 = vld [vmem:[#allocation5 + $0x7a8] sm:$0xff]  ;;  %v319_v40 = vld [vmem:[#allocation5 + $0x7d8] sm:$0xff] }
  0xc3   :  { %1581 = vmatprep.subr.bf16.mxu0 %v1580_v44  ;;  %v204_v44 = vld [vmem:[#allocation5 + $0x440] sm:$0xff] }
  0xc4   :  { %612 = vmatmul.mubr.f32.gmra.mrb[4].mxu0 %v2001_v47 }
  0xc5   :  { %778 = vmatmul.mubr.f32.gmra.mrb[4].mxu1 %v2001_v47  ;;  %1583 = vmatpush1.bf16.msra.mxu0 %v1582_v48  ;;  %v223_v48 = vld [vmem:[#allocation5 + $0x4d8] sm:$0xff] }
  0xc6   :  { %1585 = vmatprep.subr.bf16.mxu0 %v1584_v49  ;;  %848 = vmatprep.mubr.f32.mxu0 %v1959_v16  ;;  %v1598_v16 = vpack.c.bf16 %v150_v6, %v144_v5  ;;  %v1618_v49 = vpack.c.bf16 %v210_v45, %v204_v44  ;;  %v1620_v50 = vpack.c.bf16 %v223_v48, %v217_v46  ;;  %v252_v6 = vld [vmem:[#allocation5 + $0x5c0] sm:$0xff]  ;;  %v325_v44 = vld [vmem:[#allocation5 + $0x808] sm:$0xff]  ;;  %v331_v45 = vld [vmem:[#allocation5 + $0x838] sm:$0xff] }
  0xc7   :  { %v1656_v46 = vpack.c.bf16 %v331_v45, %v325_v44  ;;  %v324_v48 = vld [vmem:[#allocation5 + $0x800] sm:$0xff]  ;;  %v999_v44 = vld [vmem:[#allocation7 + $0xb0] sm:$0xff]  ;;  %v1000_v45 = vld [vmem:[#allocation7 + $0xb8] sm:$0xff] }
  0xc9   :  { %1587 = vmatpush1.bf16.msra.mxu0 %v1586_v54  ;;  %v235_v54 = vld [vmem:[#allocation5 + $0x538] sm:$0xff] }
  0xca   :  { %1589 = vmatprep.subr.bf16.mxu0 %v1588_v55  ;;  %v1622_v55 = vpack.c.bf16 %v222_v52, %v216_v51  ;;  %v1624_v56 = vpack.c.bf16 %v235_v54, %v229_v53  ;;  %v343_v51 = vld [vmem:[#allocation5 + $0x898] sm:$0xff]  ;;  %v336_v53 = vld [vmem:[#allocation5 + $0x860] sm:$0xff]  ;;  %v349_v54 = vld [vmem:[#allocation5 + $0x8c8] sm:$0xff] }
  0xcd   :  { %1591 = vmatpush1.bf16.msra.mxu0 %v1590_v60  ;;  %v247_v60 = vld [vmem:[#allocation5 + $0x598] sm:$0xff] }
  0xce   :  { %1593 = vmatprep.subr.bf16.mxu0 %v1592_v61  ;;  %v1626_v61 = vpack.c.bf16 %v234_v58, %v228_v57  ;;  %v1628_v62 = vpack.c.bf16 %v247_v60, %v241_v59  ;;  %v348_v58 = vld [vmem:[#allocation5 + $0x8c0] sm:$0xff]  ;;  %v354_v59 = vld [vmem:[#allocation5 + $0x8f0] sm:$0xff]  ;;  %v361_v60 = vld [vmem:[#allocation5 + $0x928] sm:$0xff] }
  0xd1   :  { %1595 = vmatpush1.bf16.msra.mxu0 %v1594_v2  ;;  %v259_v2 = vld [vmem:[#allocation5 + $0x5f8] sm:$0xff] }
  0xd2   :  { %1597 = vmatprep.subr.bf16.mxu0 %v1596_v4  ;;  %v1630_v4 = vpack.c.bf16 %v246_v0, %v240_v63  ;;  %v1632_v5 = vpack.c.bf16 %v259_v2, %v253_v1  ;;  %v360_v0 = vld [vmem:[#allocation5 + $0x920] sm:$0xff]  ;;  %v366_v1 = vld [vmem:[#allocation5 + $0x950] sm:$0xff]  ;;  %v373_v2 = vld [vmem:[#allocation5 + $0x988] sm:$0xff] }
  0xd5   :  { %1599 = vmatpush1.bf16.msra.mxu0 %v1598_v16  ;;  %v271_v16 = vld [vmem:[#allocation5 + $0x658] sm:$0xff] }
  0xd6   :  { %1601 = vmatprep.subr.bf16.mxu0 %v1600_v10  ;;  %v1634_v10 = vpack.c.bf16 %v258_v7, %v252_v6  ;;  %v1636_v11 = vpack.c.bf16 %v271_v16, %v265_v9  ;;  %v372_v7 = vld [vmem:[#allocation5 + $0x980] sm:$0xff]  ;;  %v378_v9 = vld [vmem:[#allocation5 + $0x9b0] sm:$0xff]  ;;  %v385_v16 = vld [vmem:[#allocation5 + $0x9e8] sm:$0xff] }
  0xd9   :  { %1603 = vmatpush1.bf16.msra.mxu0 %v1602_v17  ;;  %v283_v17 = vld [vmem:[#allocation5 + $0x6b8] sm:$0xff] }
  0xda   :  { %1605 = vmatprep.subr.bf16.mxu0 %v1604_v20  ;;  %v1638_v20 = vpack.c.bf16 %v270_v13, %v264_v12  ;;  %v1640_v21 = vpack.c.bf16 %v283_v17, %v277_v14  ;;  %v390_v12 = vld [vmem:[#allocation5 + $0xa10] sm:$0xff]  ;;  %v993_v13 = vld [vmem:[#allocation7 + $0x80] sm:$0xff]  ;;  %v994_v14 = vld [vmem:[#allocation7 + $0x88] sm:$0xff] }
  0xdb   :  { %v977_v17 = vld [vmem:[#allocation7] sm:$0xff] }
  0xdd   :  { %1607 = vmatpush1.bf16.msra.mxu0 %v1606_v25  ;;  %v295_v25 = vld [vmem:[#allocation5 + $0x718] sm:$0xff] }
  0xde   :  { %1609 = vmatprep.subr.bf16.mxu0 %v1608_v26  ;;  %v1642_v26 = vpack.c.bf16 %v282_v23, %v276_v22  ;;  %v1644_v27 = vpack.c.bf16 %v295_v25, %v289_v24  ;;  %v978_v22 = vld [vmem:[#allocation7 + $0x8] sm:$0xff]  ;;  %v995_v23 = vld [vmem:[#allocation7 + $0x90] sm:$0xff]  ;;  %v996_v24 = vld [vmem:[#allocation7 + $0x98] sm:$0xff] }
  0xe1   :  { %1611 = vmatpush1.bf16.msra.mxu0 %v1610_v33  ;;  %v307_v33 = vld [vmem:[#allocation5 + $0x778] sm:$0xff] }
  0xe2   :  { %1613 = vmatprep.subr.bf16.mxu0 %v1612_v34  ;;  %v1646_v34 = vpack.c.bf16 %v294_v29, %v288_v28  ;;  %v1648_v36 = vpack.c.bf16 %v307_v33, %v301_v32  ;;  %v979_v28 = vld [vmem:[#allocation7 + $0x10] sm:$0xff]  ;;  %v980_v29 = vld [vmem:[#allocation7 + $0x18] sm:$0xff]  ;;  %v997_v32 = vld [vmem:[#allocation7 + $0xa0] sm:$0xff] }
  0xe3   :  { %v397_v33 = vld [vmem:[#allocation5 + $0xa48] sm:$0xff] }
  0xe5   :  { %1615 = vmatpush1.bf16.msra.mxu0 %v1614_v41  ;;  %v1652_v41 = vpack.c.bf16 %v319_v40, %v313_v38  ;;  %v396_v38 = vld [vmem:[#allocation5 + $0xa40] sm:$0xff] }
  0xe6   :  { %1617 = vmatprep.subr.bf16.mxu0 %v1616_v42  ;;  %v312_v42 = vld [vmem:[#allocation5 + $0x7a0] sm:$0xff] }
  0xe9   :  { %1619 = vmatpush1.bf16.msra.mxu0 %v1618_v49  ;;  %v330_v49 = vld [vmem:[#allocation5 + $0x830] sm:$0xff] }
  0xea   :  { %1621 = vmatprep.subr.bf16.mxu0 %v1620_v50  ;;  %v337_v50 = vld [vmem:[#allocation5 + $0x868] sm:$0xff] }
  0xeb   :  { %v1660_v52 = vpack.c.bf16 %v343_v51, %v337_v50  ;;  %v408_v50 = vld [vmem:[#allocation5 + $0xaa0] sm:$0xff]  ;;  %v1712_v51 = vpack.c.bf16 %v1000_v45, %v999_v44 }
  0xed   :  { %1623 = vmatpush1.bf16.msra.mxu0 %v1622_v55  ;;  %v355_v55 = vld [vmem:[#allocation5 + $0x8f8] sm:$0xff] }
  0xee   :  { %1625 = vmatprep.subr.bf16.mxu0 %v1624_v56  ;;  %v1664_v57 = vpack.c.bf16 %v355_v55, %v349_v54  ;;  %v1001_v54 = vld [vmem:[#allocation7 + $0xc0] sm:$0xff]  ;;  %v1002_v55 = vld [vmem:[#allocation7 + $0xc8] sm:$0xff] }
  0xf1   :  { %1627 = vmatpush1.bf16.msra.mxu0 %v1626_v61  ;;  %v367_v61 = vld [vmem:[#allocation5 + $0x958] sm:$0xff] }
  0xf2   :  { %1629 = vmatprep.subr.bf16.mxu0 %v1628_v62  ;;  %v1666_v62 = vpack.c.bf16 %v354_v59, %v348_v58  ;;  %v1668_v63 = vpack.c.bf16 %v367_v61, %v361_v60  ;;  %v420_v60 = vld [vmem:[#allocation5 + $0xb00] sm:$0xff]  ;;  %v1716_v61 = vpack.c.bf16 %v1002_v55, %v1001_v54 }
  0xf5   :  { %1631 = vmatpush1.bf16.msra.mxu0 %v1630_v4  ;;  %v379_v4 = vld [vmem:[#allocation5 + $0x9b8] sm:$0xff] }
  0xf6   :  { %1633 = vmatprep.subr.bf16.mxu0 %v1632_v5  ;;  %v1670_v5 = vpack.c.bf16 %v366_v1, %v360_v0  ;;  %v1672_v6 = vpack.c.bf16 %v379_v4, %v373_v2  ;;  %v426_v1 = vld [vmem:[#allocation5 + $0xb30] sm:$0xff]  ;;  %v1004_v4 = vld [vmem:[#allocation7 + $0xd8] sm:$0xff] }
  0xf7   :  { %v1003_v2 = vld [vmem:[#allocation7 + $0xd0] sm:$0xff] }
  0xf9   :  { %1635 = vmatpush1.bf16.msra.mxu0 %v1634_v10  ;;  %v391_v10 = vld [vmem:[#allocation5 + $0xa18] sm:$0xff] }
  0xfa   :  { %1637 = vmatprep.subr.bf16.mxu0 %v1636_v11  ;;  %v384_v11 = vld [vmem:[#allocation5 + $0x9e0] sm:$0xff]  ;;  %v1676_v25 = vpack.c.bf16 %v391_v10, %v385_v16  ;;  %v1720_v10 = vpack.c.bf16 %v1004_v4, %v1003_v2 }
  0xfb   :  { %v432_v16 = vld [vmem:[#allocation5 + $0xb60] sm:$0xff] }
  0xfc   :  { %849 = vmatmul.mubr.f32.vlgmr.msra.gmra.mrb[6].mxu0 %v1963_v15  ;;  %v306_v15 = vld [vmem:[#allocation5 + $0x770] sm:$0xff] }
  0xfd   :  { %1639 = vmatpush1.bf16.msra.mxu0 %v1638_v20  ;;  %854 = vmatprep.mubr.f32.mxu0 %v1967_v3  ;;  %v1650_v3 = vpack.c.bf16 %v306_v15, %v300_v37  ;;  %v1674_v20 = vpack.c.bf16 %v378_v9, %v372_v7  ;;  %v1706_v37 = vpack.c.bf16 %v980_v29, %v979_v28  ;;  %v444_v29 = vld [vmem:[#allocation5 + $0xbc0] sm:$0xff] }
  0xfe   :  { %1641 = vmatprep.subr.bf16.mxu0 %v1640_v21  ;;  %v1700_v21 = vpack.c.bf16 %v994_v14, %v993_v13  ;;  %v1678_v15 = vpack.c.bf16 %v390_v12, %v384_v11  ;;  %v1690_v9 = vpack.c.bf16 %v426_v1, %v420_v60  ;;  %v987_v11 = vld [vmem:[#allocation7 + $0x50] sm:$0xff]  ;;  %v988_v12 = vld [vmem:[#allocation7 + $0x58] sm:$0xff] }
  0xff   :  { %v438_v14 = vld [vmem:[#allocation5 + $0xb90] sm:$0xff] }
 0x100   :  { %855 = vmatmul.mubr.f32.gmra.mrb[8].mxu0 %v1969_v8  ;;  %v318_v8 = vld [vmem:[#allocation5 + $0x7d0] sm:$0xff]  ;;  %1701 = vmatprep.subr.bf16.mxu1 %v1700_v21  ;;  %v445_v21 = vld [vmem:[#allocation5 + $0xbc8] sm:$0xff] }
 0x101   :  { %1643 = vmatpush1.bf16.msra.mxu0 %v1642_v26  ;;  %860 = vmatprep.mubr.f32.mxu0 %v1975_v18  ;;  %v1654_v18 = vpack.c.bf16 %v318_v8, %v312_v42  ;;  %v1702_v26 = vpack.c.bf16 %v978_v22, %v977_v17  ;;  %v402_v8 = vld [vmem:[#allocation5 + $0xa70] sm:$0xff]  ;;  %v1005_v17 = vld [vmem:[#allocation7 + $0xe0] sm:$0xff]  ;;  %v451_v22 = vld [vmem:[#allocation5 + $0xbf8] sm:$0xff] }
 0x102   :  { %1645 = vmatprep.subr.bf16.mxu0 %v1644_v27  ;;  %v1704_v27 = vpack.c.bf16 %v996_v24, %v995_v23  ;;  %v1722_v23 = vpack.c.bf16 %v988_v12, %v987_v11  ;;  %v1694_v24 = vpack.c.bf16 %v438_v14, %v432_v16  ;;  %v1696_v28 = vpack.c.bf16 %v451_v22, %v445_v21  ;;  %v1014_v21 = vld [vmem:[#allocation7 + $0x128] sm:$0xff] }
 0x103   :  { %1703 = vmatpush3.bf16.msra.mxu1 %v1702_v26  ;;  %v989_v26 = vld [vmem:[#allocation7 + $0x60] sm:$0xff] }
 0x104   :  { %861 = vmatmul.mubr.f32.gmra.mrb[10].mxu0 %v1977_v19  ;;  %v1658_v19 = vpack.c.bf16 %v330_v49, %v324_v48  ;;  %1705 = vmatprep.subr.bf16.mxu1 %v1704_v27  ;;  %v1682_v49 = vpack.c.bf16 %v402_v8, %v396_v38  ;;  %v990_v27 = vld [vmem:[#allocation7 + $0x68] sm:$0xff] }
 0x105   :  { %1647 = vmatpush1.bf16.msra.mxu0 %v1646_v34  ;;  %931 = vmatprep.mubr.f32.mxu0 %v1982_v31  ;;  %v342_v31 = vld [vmem:[#allocation5 + $0x890] sm:$0xff]  ;;  %v403_v34 = vld [vmem:[#allocation5 + $0xa78] sm:$0xff] }
 0x106   :  { %1649 = vmatprep.subr.bf16.mxu0 %v1648_v36  ;;  %v1662_v56 = vpack.c.bf16 %v342_v31, %v336_v53  ;;  %v998_v36 = vld [vmem:[#allocation7 + $0xa8] sm:$0xff]  ;;  %v1680_v42 = vpack.c.bf16 %v403_v34, %v397_v33  ;;  %v414_v31 = vld [vmem:[#allocation5 + $0xad0] sm:$0xff]  ;;  %v1726_v33 = vpack.c.bf16 %v990_v27, %v989_v26 }
 0x107   :  { %v1708_v40 = vpack.c.bf16 %v998_v36, %v997_v32  ;;  %1707 = vmatpush3.bf16.msra.mxu1 %v1706_v37  ;;  %v1686_v59 = vpack.c.bf16 %v414_v31, %v408_v50  ;;  %v450_v32 = vld [vmem:[#allocation5 + $0xbf0] sm:$0xff]  ;;  %v1008_v37 = vld [vmem:[#allocation7 + $0xf8] sm:$0xff] }
 0x108   :  { %v1698_v34 = vpack.c.bf16 %v450_v32, %v444_v29  ;;  %v1007_v36 = vld [vmem:[#allocation7 + $0xf0] sm:$0xff] }
 0x109   :  { %1651 = vmatpush1.bf16.msra.mxu0 %v1650_v3  ;;  %v981_v3 = vld [vmem:[#allocation7 + $0x20] sm:$0xff]  ;;  %1709 = vmatprep.subr.bf16.mxu1 %v1708_v40  ;;  %v1728_v38 = vpack.c.bf16 %v1008_v37, %v1007_v36  ;;  %v991_v40 = vld [vmem:[#allocation7 + $0x70] sm:$0xff]  ;;  %v1898_v36 = vmov 0.0  }
 0x10a   :  { %1653 = vmatprep.subr.bf16.mxu0 %v1652_v41  ;;  %v982_v41 = vld [vmem:[#allocation7 + $0x28] sm:$0xff]  ;;  %v1015_v32 = vld [vmem:[#allocation7 + $0x130] sm:$0xff]  ;;  %v1017_v37 = vld [vmem:[#allocation7 + $0x140] sm:$0xff] }
 0x10b   :  { %v1710_v48 = vpack.c.bf16 %v982_v41, %v981_v3  ;;  %v992_v3 = vld [vmem:[#allocation7 + $0x78] sm:$0xff] }
 0x10c   :  { %v1730_v44 = vpack.c.bf16 %v992_v3, %v991_v40  ;;  %v1019_v40 = vld [vmem:[#allocation7 + $0x150] sm:$0xff]  ;;  %v1020_v3 = vld [vmem:[#allocation7 + $0x158] sm:$0xff] }
 0x10d   :  { %1655 = vmatpush1.bf16.msra.mxu0 %v1654_v18  ;;  %v409_v18 = vld [vmem:[#allocation5 + $0xaa8] sm:$0xff]  ;;  %1711 = vmatpush3.bf16.msra.mxu1 %v1710_v48  ;;  %v1896_v48 = vmov 0.0|0.0  }
 0x10e   :  { %1657 = vmatprep.subr.bf16.mxu0 %v1656_v46  ;;  %v415_v46 = vld [vmem:[#allocation5 + $0xad8] sm:$0xff]  ;;  %1713 = vmatprep.subr.bf16.mxu1 %v1712_v51 }
 0x10f   :  { %v1684_v53 = vpack.c.bf16 %v415_v46, %v409_v18 }
 0x111   :  { %1659 = vmatpush1.bf16.msra.mxu0 %v1658_v19  ;;  %v983_v19 = vld [vmem:[#allocation7 + $0x30] sm:$0xff] }
 0x112   :  { %1661 = vmatprep.subr.bf16.mxu0 %v1660_v52  ;;  %v984_v52 = vld [vmem:[#allocation7 + $0x38] sm:$0xff] }
 0x113   :  { %v1714_v58 = vpack.c.bf16 %v984_v52, %v983_v19 }
 0x115   :  { %1663 = vmatpush1.bf16.msra.mxu0 %v1662_v56  ;;  %v421_v56 = vld [vmem:[#allocation5 + $0xb08] sm:$0xff]  ;;  %1715 = vmatpush3.bf16.msra.mxu1 %v1714_v58 }
 0x116   :  { %1665 = vmatprep.subr.bf16.mxu0 %v1664_v57  ;;  %v427_v57 = vld [vmem:[#allocation5 + $0xb38] sm:$0xff]  ;;  %1717 = vmatprep.subr.bf16.mxu1 %v1716_v61  ;;  %v1010_v58 = vld [vmem:[#allocation7 + $0x108] sm:$0xff] }
 0x117   :  { %v1688_v0 = vpack.c.bf16 %v427_v57, %v421_v56  ;;  %v1009_v57 = vld [vmem:[#allocation7 + $0x100] sm:$0xff] }
 0x118   :  { %v1733_v1 = vpack.c.bf16 %v1010_v58, %v1009_v57 }
 0x119   :  { %1667 = vmatpush1.bf16.msra.mxu0 %v1666_v62  ;;  %v985_v62 = vld [vmem:[#allocation7 + $0x40] sm:$0xff] }
 0x11a   :  { %1669 = vmatprep.subr.bf16.mxu0 %v1668_v63  ;;  %v986_v63 = vld [vmem:[#allocation7 + $0x48] sm:$0xff] }
 0x11b   :  { %v1718_v7 = vpack.c.bf16 %v986_v63, %v985_v62 }
 0x11d   :  { %1671 = vmatpush1.bf16.msra.mxu0 %v1670_v5  ;;  %v433_v5 = vld [vmem:[#allocation5 + $0xb68] sm:$0xff]  ;;  %1719 = vmatpush3.bf16.msra.mxu1 %v1718_v7 }
 0x11e   :  { %1673 = vmatprep.subr.bf16.mxu0 %v1672_v6  ;;  %v439_v6 = vld [vmem:[#allocation5 + $0xb98] sm:$0xff]  ;;  %1721 = vmatprep.subr.bf16.mxu1 %v1720_v10 }
 0x11f   :  { %v1692_v13 = vpack.c.bf16 %v439_v6, %v433_v5  ;;  %v1011_v5 = vld [vmem:[#allocation7 + $0x110] sm:$0xff]  ;;  %v1012_v6 = vld [vmem:[#allocation7 + $0x118] sm:$0xff] }
 0x121   :  { %1675 = vmatpush1.bf16.msra.mxu0 %v1674_v20  ;;  %v1006_v20 = vld [vmem:[#allocation7 + $0xe8] sm:$0xff]  ;;  %1723 = vmatpush3.bf16.msra.mxu1 %v1722_v23 }
 0x122   :  { %1677 = vmatprep.subr.bf16.mxu0 %v1676_v25  ;;  %v1724_v25 = vpack.c.bf16 %v1006_v20, %v1005_v17  ;;  %v1013_v20 = vld [vmem:[#allocation7 + $0x120] sm:$0xff] }
 0x124   :  { %1725 = vmatprep.subr.bf16.mxu1 %v1724_v25 }
 0x125   :  { %1679 = vmatpush1.bf16.msra.mxu0 %v1678_v15  ;;  %1727 = vmatpush3.bf16.msra.mxu1 %v1726_v33  ;;  %v1016_v33 = vld [vmem:[#allocation7 + $0x138] sm:$0xff] }
 0x126   :  { %1681 = vmatprep.subr.bf16.mxu0 %v1680_v42  ;;  %1729 = vmatprep.subr.bf16.mxu1 %v1728_v38 }
 0x129   :  { %1683 = vmatpush1.bf16.msra.mxu0 %v1682_v49  ;;  %1731 = vmatpush3.bf16.msra.mxu1 %v1730_v44 }
 0x12a   :  { %1685 = vmatprep.subr.bf16.mxu0 %v1684_v53  ;;  %1732 = vmatprep.subr.bf16.mxu1 %v1896_v48 }
 0x12d   :  { %1687 = vmatpush1.bf16.msra.mxu0 %v1686_v59 }
 0x12e   :  { %1689 = vmatprep.subr.bf16.mxu0 %v1688_v0 }
 0x131   :  { %1691 = vmatpush1.bf16.msra.mxu0 %v1690_v9 }
 0x132   :  { %1693 = vmatprep.subr.bf16.mxu0 %v1692_v13  ;;  %v1736_v13 = vpack.c.bf16 %v1012_v6, %v1011_v5 }
 0x135   :  { %1695 = vmatpush1.bf16.msra.mxu0 %v1694_v24 }
 0x136   :  { %1697 = vmatprep.subr.bf16.mxu0 %v1696_v28  ;;  %v1739_v28 = vpack.c.bf16 %v1014_v21, %v1013_v20 }
 0x139   :  { %1699 = vmatpush1.bf16.msra.mxu0 %v1698_v34  ;;  %v1742_v34 = vpack.c.bf16 %v1016_v33, %v1015_v32 }
 0x13c   :  { %932 = vmatmul.mubr.f32.vlgmr.msra.gmra.mrb[6].mxu0 %v1987_v30 }
 0x13d   :  { %937 = vmatprep.mubr.f32.mxu0 %v1989_v35 }
 0x140   :  { %938 = vmatmul.mubr.f32.gmra.mrb[8].mxu0 %v1993_v39 }
 0x141   :  { %943 = vmatprep.mubr.f32.mxu0 %v1997_v43 }
 0x144   :  { %944 = vmatmul.mubr.f32.gmra.mrb[10].mxu0 %v2001_v47 }
 0x18f   :  { %v601_v15 = vpop.f32.mrb[0].mxu0 }
 0x190   :  { %v950_v41 = vmul.f32 %v601_v15, %v601_v15  ;;  %v767_v42 = vpop.f32.mrb[0].mxu1  ;;  %v603_v8 = vpop.f32.mrb[1].mxu0  ;;  %v1018_v15 = vld [vmem:[#allocation7 + $0x148] sm:$0xff] }
 0x191   :  { %v769_v45 = vpop.f32.mrb[1].mxu1  ;;  %v951_v59 = vmul.f32 %v603_v8, %v603_v8  ;;  %v952_v62 = vmul.f32 %v767_v42, %v767_v42  ;;  %v1745_v38 = vpack.c.bf16 %v1018_v15, %v1017_v37  ;;  %v1021_v42 = vld [vmem:[#allocation7 + $0x160] sm:$0xff]  ;;  %v1022_v8 = vld [vmem:[#allocation7 + $0x168] sm:$0xff] }
 0x192   :  { %v959_v30 = vmul.f32 %v769_v45, %v769_v45  ;;  %v1751_v44 = vpack.c.bf16 %v1022_v8, %v1021_v42  ;;  %v1023_v45 = vld [vmem:[#allocation7 + $0x170] sm:$0xff] }
 0x193   :  { %v607_v35 = vpop.f32.mrb[2].mxu0 }
 0x194   :  { %v968_v39 = vadd.f32 %v959_v30, %v950_v41  ;;  %v953_v18 = vmul.f32 %v607_v35, %v607_v35  ;;  %v773_v43 = vpop.f32.mrb[2].mxu1  ;;  %v609_v46 = vpop.f32.mrb[3].mxu0  ;;  %v1748_v41 = vpack.c.bf16 %v1020_v3, %v1019_v40  ;;  %v1024_v30 = vld [vmem:[#allocation7 + $0x178] sm:$0xff] }
 0x195   :  { %v775_v47 = vpop.f32.mrb[3].mxu1  ;;  %v954_v7 = vmul.f32 %v609_v46, %v609_v46  ;;  %v955_v10 = vmul.f32 %v773_v43, %v773_v43  ;;  %v1754_v35 = vpack.c.bf16 %v1024_v30, %v1023_v45 }
 0x196   :  { %v962_v49 = vmul.f32 %v775_v47, %v775_v47 }
 0x197   :  { %v613_v50 = vpop.f32.mrb[4].mxu0 }
 0x198   :  { %v971_v51 = vadd.f32 %v962_v49, %v953_v18  ;;  %v956_v19 = vmul.f32 %v613_v50, %v613_v50  ;;  %v779_v52 = vpop.f32.mrb[4].mxu1  ;;  %v615_v53 = vpop.f32.mrb[5].mxu0 }
 0x199   :  { %v781_v31 = vpop.f32.mrb[5].mxu1  ;;  %v957_v22 = vmul.f32 %v615_v53, %v615_v53  ;;  %v958_v25 = vmul.f32 %v779_v52, %v779_v52 }
 0x19a   :  { %v965_v54 = vmul.f32 %v781_v31, %v781_v31 }
 0x19c   :  { %v974_v55 = vadd.f32 %v965_v54, %v956_v19 }
 0x20f   :  { %v933_v56 = vpop.f32.mrb[6].mxu0 }
 0x210   :  { %v960_v60 = vmul.f32 %v933_v56, %v933_v56  ;;  %v935_v61 = vpop.f32.mrb[7].mxu0 }
 0x211   :  { %v961_v63 = vmul.f32 %v935_v61, %v935_v61 }
 0x212   :  { %v969_v0 = vadd.f32 %v960_v60, %v951_v59 }
 0x213   :  { %v970_v2 = vadd.f32 %v961_v63, %v952_v62  ;;  %v939_v4 = vpop.f32.mrb[8].mxu0 }
 0x214   :  { %v963_v9 = vmul.f32 %v939_v4, %v939_v4  ;;  %v941_v16 = vpop.f32.mrb[9].mxu0  ;;  %1089 = vmatprep.mubr.f32.mxu1 %v969_v0 }
 0x215   :  { %v964_v11 = vmul.f32 %v941_v16, %v941_v16  ;;  %1090 = vmatmul.mubr.f32.vlgmr.msra.gmra.mrb[6].mxu1 %v968_v39 }
 0x216   :  { %v972_v12 = vadd.f32 %v963_v9, %v954_v7  ;;  %1734 = vmatpush3.bf16.msra.mxu1 %v1733_v1 }
 0x217   :  { %v973_v14 = vadd.f32 %v964_v11, %v955_v10  ;;  %v945_v17 = vpop.f32.mrb[10].mxu0  ;;  %1735 = vmatprep.subr.bf16.mxu1 %v1896_v48 }
 0x218   :  { %v966_v23 = vmul.f32 %v945_v17, %v945_v17  ;;  %v947_v24 = vpop.f32.mrb[11].mxu0  ;;  %1094 = vmatprep.mubr.f32.mxu1 %v972_v12 }
 0x219   :  { %v967_v26 = vmul.f32 %v947_v24, %v947_v24  ;;  %1095 = vmatmul.mubr.f32.gmra.mrb[8].mxu1 %v971_v51 }
 0x21a   :  { %v975_v27 = vadd.f32 %v966_v23, %v957_v22  ;;  %1737 = vmatpush3.bf16.msra.mxu1 %v1736_v13 }
 0x21b   :  { %v976_v29 = vadd.f32 %v967_v26, %v958_v25  ;;  %1738 = vmatprep.subr.bf16.mxu1 %v1896_v48 }
 0x21c   :  { %1099 = vmatprep.mubr.f32.mxu1 %v975_v27 }
 0x21d   :  { %1100 = vmatmul.mubr.f32.gmra.mrb[10].mxu1 %v974_v55 }
 0x21e   :  { %1740 = vmatpush3.bf16.msra.mxu1 %v1739_v28  ;;  %1307 = vmatprep.mubr.msk.f32.mxu1 %vm1897_vm0, %v1898_v36 }
 0x21f   :  { %1741 = vmatprep.subr.bf16.mxu1 %v1896_v48 }
 0x222   :  { %1743 = vmatpush3.bf16.msra.mxu1 %v1742_v34 }
 0x223   :  { %1744 = vmatprep.subr.bf16.mxu1 %v1896_v48 }
 0x226   :  { %1746 = vmatpush3.bf16.msra.mxu1 %v1745_v38 }
 0x227   :  { %1747 = vmatprep.subr.bf16.mxu1 %v1896_v48 }
 0x22a   :  { %1749 = vmatpush3.bf16.msra.mxu1 %v1748_v41 }
 0x22b   :  { %1750 = vmatprep.subr.bf16.mxu1 %v1896_v48 }
 0x22e   :  { %1752 = vmatpush3.bf16.msra.mxu1 %v1751_v44 }
 0x22f   :  { %1753 = vmatprep.subr.bf16.mxu1 %v1896_v48 }
 0x232   :  { %1755 = vmatpush3.bf16.msra.mxu1 %v1754_v35 }
 0x235   :  { %1308 = vmatmul.mubr.f32.vlgmr.msra.gmra.mrb[12].mxu1 %v970_v2 }
 0x236   :  { %1310 = vmatprep.mubr.msk.f32.mxu1 %vm1897_vm0, %v1898_v36 }
 0x239   :  { %1311 = vmatmul.mubr.f32.gmra.mrb[14].mxu1 %v973_v14 }
 0x23a   :  { %1313 = vmatprep.mubr.msk.f32.mxu1 %vm1897_vm0, %v1898_v36 }
 0x23d   :  { %1314 = vmatmul.mubr.f32.gmra.mrb[16].mxu1 %v976_v29 }
 0x2e8   :  { %v1247_v39 = vpop.f32.mrb[6].mxu1 }
 0x2e9   :  { %v1248_v18 = vpop.f32.mrb[7].mxu1 }
 0x2ea   :  { %v1249_v43 = vadd.f32 %v1248_v18, %v1247_v39 }
 0x2ec   :  { %v1250_v46 = vpop.f32.mrb[8].mxu1 }
 0x2ed   :  { %v1251_v47 = vpop.f32.mrb[9].mxu1 }
 0x2ee   :  { %v1252_v49 = vadd.f32 %v1251_v47, %v1250_v46 }
 0x2f0   :  { %v1253_v50 = vpop.f32.mrb[10].mxu1 }
 0x2f1   :  { %v1254_v51 = vpop.f32.mrb[11].mxu1 }
 0x2f2   :  { %v1255_v19 = vadd.f32 %v1254_v51, %v1253_v50 }
 0x308   :  { %v1171_v52 = vpop.f32.mrb[12].mxu1 }
 0x309   :  { %v1172_v53 = vadd.f32 %v1249_v43, %v1171_v52  ;;  %v1309_v48 = vpop.f32.mrb[13].mxu1 }
 0x30b   :  { %v1185_v31 = vmax.f32 %v1172_v53, 1e-10 }
 0x30c   :  { %v1176_v54 = vpop.f32.mrb[14].mxu1 }
 0x30d   :  { %1787 = vlog2.f32 %v1185_v31  ;;  %v1177_v55 = vadd.f32 %v1252_v49, %v1176_v54  ;;  %v1312_v56 = vpop.f32.mrb[15].mxu1 }
 0x30f   :  { %v1186_v57 = vmax.f32 %v1177_v55, 1e-10 }
 0x310   :  { %v1181_v58 = vpop.f32.mrb[16].mxu1 }
 0x311   :  { %1789 = vlog2.f32 %v1186_v57  ;;  %v1182_v59 = vadd.f32 %v1255_v19, %v1181_v58  ;;  %v1315_v60 = vpop.f32.mrb[17].mxu1 }
 0x313   :  { %v1187_v61 = vmax.f32 %v1182_v59, 1e-10 }
 0x315   :  { %1791 = vlog2.f32 %v1187_v61 }
 0x317   :  { %v1788_v62 = vpop.eup %1787 }
 0x318   :  { %v1189_v63 = vmul.f32 0.6931472, %v1788_v62 }
 0x31a   :  { %1194 = vst [vmem:[#allocation8] sm:$0xff] %v1189_v63 }
 0x31b   :  { %v1790_v0 = vpop.eup %1789 }
 0x31c   :  { %v1191_v1 = vmul.f32 0.6931472, %v1790_v0 }
 0x31e   :  { %1195 = vst [vmem:[#allocation8 + $0x8] sm:$0xff] %v1191_v1 }
 0x31f   :  { %v1792_v2 = vpop.eup %1791 }
 0x320   :  { %v1193_v4 = vmul.f32 0.6931472, %v1792_v2 }
 0x322   :  { %1196 = vst [vmem:[#allocation8 + $0x10] sm:$0xff] %v1193_v4 }
 0x323   :  { %1870 = shalt.err (!%p1867_p0)
}
 0x324   :  { %s1871_s29 = scalar_lea.hbm %s2048_s3, 384 }
 0x325   :  { %p1872_p1 = scmp.ne.s32.totalorder %s2048_s3, %s1871_s29  ;;  %p1875_p2 = scmp.lt.u32.totalorder %s1871_s29, %s2048_s3 }
 0x327   :  { %p1877_p3 = pnand %p1875_p2, %p1872_p1 }
 0x329   :  { %1880 = shalt.err (!%p1877_p3)
}
 0x32a   :  { %1208 = dma.vmem_to_hbm [thread:$0]  %s1203_s25, 384, %s2048_s3, [#allocation4], %s1894_s0, %s1894_s0, %s1895_s22  }
 0x32b   :  { %1885 = dma.done.wait [#allocation4], 384  }
 0x32c   :  { %1886 = vsyncadd [#allocation4], 4294966912 }
 0x32d   :  { %1212 = vsyncpa [#allocation3], 1 }
 0x32e   :  { %1213 = vsyncpa [#allocation6], 1 }
 0x32f   :  { %1214 = vsyncpa [#allocation4], 1 }

</bundles_post_ra>
